<compile_context>
chip_gen: v6e
topology: v6e:2x2x1
jax: 0.10.0
libtpu: 0.0.40
codegen_flags: <defaults>
</compile_context>

<pallas_src>
import functools

import jax
import jax.numpy as jnp
from jax.experimental import pallas as pl
from jax.experimental.pallas import tpu as pltpu


# ----------------------------------------------------------------------------
# Fused multi-layer transformer-encoder kernel.
# grid = (B, L); for each batch element the activation (S, D) lives in a VMEM
# scratch across all L layers.  Per-layer weights are stacked on a leading L
# axis and indexed by the layer grid step.
# ----------------------------------------------------------------------------
def fused_encoder_kernel(x_ref, bias_ref,
                         wq_ref, wk_ref, wv_ref, wo_ref,
                         w1_ref, w2_ref, vecs_ref, b1_ref,
                         o_ref, act_ref, *, num_heads):
    l = pl.program_id(1)

    # First layer for this batch block: load the activation into VMEM scratch.
    @pl.when(l == 0)
    def _():
        act_ref[...] = x_ref[0].astype(jnp.float32)

    x = act_ref[...]                       # (S, D) f32, resident across layers
    S, D = x.shape
    H = num_heads
    Dh = D // H

    vecs = vecs_ref[0]                     # (9, D) f32 packed per-layer vectors
    bq = vecs[0:1, :]                      # 1/sqrt(Dh) already folded in
    bk = vecs[1:2, :]
    bv = vecs[2:3, :]
    bo = vecs[3:4, :]
    b2 = vecs[4:5, :]
    ln1_g = vecs[5:6, :]
    ln1_b = vecs[6:7, :]
    ln2_g = vecs[7:8, :]
    ln2_b = vecs[8:9, :]
    b1 = b1_ref[0]                         # (1, F) f32
    key_bias = bias_ref[0]                 # (1, S): 0 real keys, -1e9 padded

    xb = x.astype(jnp.bfloat16)

    # ---- lane-dense Q/K/V projections (scale folded into wq/bq) -------------
    q = jnp.dot(xb, wq_ref[0], preferred_element_type=jnp.float32) + bq
    k = jnp.dot(xb, wk_ref[0], preferred_element_type=jnp.float32) + bk
    v = jnp.dot(xb, wv_ref[0], preferred_element_type=jnp.float32) + bv
    qb = q.astype(jnp.bfloat16)
    kb = k.astype(jnp.bfloat16)
    vb = v.astype(jnp.bfloat16)

    # ---- heads via lane-tile-aligned slices; batched score/context ----------
    qh = jnp.stack([qb[:, h * Dh:(h + 1) * Dh] for h in range(H)], axis=0)
    kh = jnp.stack([kb[:, h * Dh:(h + 1) * Dh] for h in range(H)], axis=0)
    vh = jnp.stack([vb[:, h * Dh:(h + 1) * Dh] for h in range(H)], axis=0)

    s = jnp.einsum('hqe,hke->hqk', qh, kh,
                   preferred_element_type=jnp.float32)       # (H, S, S) f32
    s = s + key_bias[None]                                   # key-padding mask
    s = s - jnp.max(s, axis=-1, keepdims=True)
    p = jnp.exp(s)
    p = p * pl.reciprocal(jnp.sum(p, axis=-1, keepdims=True), approx=True)

    ctx = jnp.einsum('hqk,hke->hqe', p.astype(jnp.bfloat16), vh,
                     preferred_element_type=jnp.float32)     # (H, S, Dh)
    ctx_sd = jnp.concatenate([ctx[h] for h in range(H)], axis=-1)  # (S, D)

    # ---- single lane-dense output projection ---------------------------------
    attn = jnp.dot(ctx_sd.astype(jnp.bfloat16), wo_ref[0],
                   preferred_element_type=jnp.float32) + bo

    def layernorm(z, g, b):
        mu = jnp.mean(z, axis=-1, keepdims=True)
        var = jnp.mean(jnp.square(z - mu), axis=-1, keepdims=True)
        return (z - mu) * jax.lax.rsqrt(var + 1e-5) * g + b

    # ---- post-norm encoder layer (PyTorch default norm_first=False) ----------
    y = layernorm(x + attn, ln1_g, ln1_b)

    h1 = jnp.dot(y.astype(jnp.bfloat16), w1_ref[0],
                 preferred_element_type=jnp.float32) + b1
    h1 = jnp.maximum(h1, 0.0)
    ffn = jnp.dot(h1.astype(jnp.bfloat16), w2_ref[0],
                  preferred_element_type=jnp.float32) + b2

    out = layernorm(y + ffn, ln2_g, ln2_b)
    act_ref[...] = out

    # ---- finalize: write only this batch's CLS-token features ----------------
    @pl.when(l == pl.num_programs(1) - 1)
    def _():
        o_ref[...] = out[0:1, :].reshape(1, 1, D).astype(o_ref.dtype)


def fused_transformer_layers(x_bsd, key_bias_b1s, packed, *, num_heads):
    """x_bsd: (B,S,D) f32; key_bias_b1s: (B,1,S) f32 additive key-padding bias."""
    B, S, D = x_bsd.shape
    L = packed["wq"].shape[0]
    F = packed["w1"].shape[-1]

    kernel = functools.partial(fused_encoder_kernel, num_heads=num_heads)
    wspec = lambda shape: pl.BlockSpec((1,) + shape, lambda b, l: (l, 0, 0))

    out = pl.pallas_call(
        kernel,
        out_shape=jax.ShapeDtypeStruct((B, 1, D), jnp.float32),
        grid_spec=pltpu.PrefetchScalarGridSpec(
            num_scalar_prefetch=0,
            grid=(B, L),                                       # batch, layers
            in_specs=[
                pl.BlockSpec((1, S, D), lambda b, l: (b, 0, 0)),  # x (per batch)
                pl.BlockSpec((1, 1, S), lambda b, l: (b, 0, 0)),  # key-pad bias
                wspec((D, D)), wspec((D, D)),                     # wq, wk
                wspec((D, D)), wspec((D, D)),                     # wv, wo
                wspec((D, F)), wspec((F, D)),                     # w1, w2
                wspec((9, D)),                                    # packed vectors
                wspec((1, F)),                                    # b1
            ],
            out_specs=pl.BlockSpec((1, 1, D), lambda b, l: (b, 0, 0)),
            scratch_shapes=[pltpu.VMEM((S, D), jnp.float32)],     # resident act
        ),
        compiler_params=pltpu.CompilerParams(
            dimension_semantics=("parallel", "arbitrary"),
            # Re-budget for production shapes (double-buffered stacked weights).
            vmem_limit_bytes=32 * 1024 * 1024),
    )(x_bsd, key_bias_b1s,
      packed["wq"], packed["wk"], packed["wv"], packed["wo"],
      packed["w1"], packed["w2"], packed["vecs"], packed["b1"])
    return out[:, 0, :]


# ----------------------------------------------------------------------------
# Model glue (embedding lookup, positional encoding, weight packing, masking)
# ----------------------------------------------------------------------------
def make_positional_encoding(max_len, d_model):
    position = jnp.arange(max_len, dtype=jnp.float32)[:, None]
    div_term = jnp.exp(jnp.arange(0, d_model, 2, dtype=jnp.float32)
                       * (-jnp.log(10000.0) / d_model))
    pe = jnp.zeros((max_len, d_model), jnp.float32)
    pe = pe.at[:, 0::2].set(jnp.sin(position * div_term))
    pe = pe.at[:, 1::2].set(jnp.cos(position * div_term))
    return pe[:, None, :]                       # (max_len, 1, d_model) buffer


def init_params(key, vocab_size, hidden_dim, num_layers, ff_dim):
    keys = jax.random.split(key, 1 + num_layers)
    emb = jax.random.normal(keys[0], (vocab_size, hidden_dim), jnp.float32) * 0.02
    layers = []
    for i in range(num_layers):
        k0, k1, k2, k3, _ = jax.random.split(keys[1 + i], 5)
        layers.append(dict(
            wqkv=jax.random.normal(k0, (hidden_dim, 3 * hidden_dim), jnp.float32) * 0.05,
            bqkv=jnp.zeros((1, 3 * hidden_dim), jnp.float32),
            wo=jax.random.normal(k1, (hidden_dim, hidden_dim), jnp.float32) * 0.05,
            bo=jnp.zeros((1, hidden_dim), jnp.float32),
            ln1_g=jnp.ones((1, hidden_dim), jnp.float32),
            ln1_b=jnp.zeros((1, hidden_dim), jnp.float32),
            w1=jax.random.normal(k2, (hidden_dim, ff_dim), jnp.float32) * 0.05,
            b1=jnp.zeros((1, ff_dim), jnp.float32),
            w2=jax.random.normal(k3, (ff_dim, hidden_dim), jnp.float32) * 0.05,
            b2=jnp.zeros((1, hidden_dim), jnp.float32),
            ln2_g=jnp.ones((1, hidden_dim), jnp.float32),
            ln2_b=jnp.zeros((1, hidden_dim), jnp.float32),
        ))
    return emb, layers


def pack_layer_params(layers, num_heads):
    """Stack per-layer params on a leading L axis.

    Weights stay unsplit (lane-dense) and are cast to bf16 for the MXU; the
    1/sqrt(Dh) attention scale is folded into wq / bq; all (1, D) vectors are
    packed into a single (L, 9, D) f32 tensor."""
    D = layers[0]["wqkv"].shape[0]
    Dh = D // num_heads
    scale = 1.0 / (Dh ** 0.5)

    def stack(f, dtype=None):
        arr = jnp.stack([f(p) for p in layers])
        return arr if dtype is None else arr.astype(dtype)

    packed = dict(
        wq=stack(lambda p: p["wqkv"][:, 0 * D:1 * D] * scale, jnp.bfloat16),
        wk=stack(lambda p: p["wqkv"][:, 1 * D:2 * D], jnp.bfloat16),
        wv=stack(lambda p: p["wqkv"][:, 2 * D:3 * D], jnp.bfloat16),
        wo=stack(lambda p: p["wo"], jnp.bfloat16),
        w1=stack(lambda p: p["w1"], jnp.bfloat16),
        w2=stack(lambda p: p["w2"], jnp.bfloat16),
        b1=stack(lambda p: p["b1"]),                              # (L, 1, F) f32
        vecs=stack(lambda p: jnp.concatenate([
            p["bqkv"][:, 0 * D:1 * D] * scale,                    # bq (scaled)
            p["bqkv"][:, 1 * D:2 * D],                            # bk
            p["bqkv"][:, 2 * D:3 * D],                            # bv
            p["bo"], p["b2"],
            p["ln1_g"], p["ln1_b"], p["ln2_g"], p["ln2_b"],
        ], axis=0)),                                              # (L, 9, D) f32
    )
    return packed


def custom_transformer_forward(input_ids, attention_mask, emb, packed, pe_buf,
                               *, num_heads):
    B, S = input_ids.shape

    # nn.Embedding lookup (glue).
    x = emb[input_ids]                                        # (B, S, D)
    # PositionalEncoding applied pre-transpose: pe[:B] broadcasts over seq
    # (reproduces the reference module exactly).
    x = x + pe_buf[:B]                                        # (B,1,D) broadcast
    x = x.astype(jnp.float32)

    # Key-padding additive bias only (attention is per-batch inside the kernel).
    key_bias = jnp.where(attention_mask.astype(bool), 0.0, -1e9)
    key_bias = key_bias.astype(jnp.float32)[:, None, :]       # (B, 1, S)

    return fused_transformer_layers(x, key_bias, packed, num_heads=num_heads)


if __name__ == "__main__":
    # Small but lane-dense shapes: D multiple of 128, Dh = 128 (as in the
    # reference config hidden=4096 / heads=32).
    VOCAB = 100
    HIDDEN = 256
    HEADS = 2
    LAYERS = 2
    MAX_SEQ = 16
    B, S = 2, 8

    key = jax.random.PRNGKey(0)
    k_ids, k_par = jax.random.split(key)

    input_ids = jax.random.randint(k_ids, (B, S), 0, VOCAB, dtype=jnp.int32)
    attention_mask = jnp.array(
        [[1, 1, 1, 1, 1, 1, 1, 1],
         [1, 1, 1, 1, 1, 0, 0, 0]], dtype=jnp.int32)          # second row padded

    emb, layers = init_params(k_par, VOCAB, HIDDEN, LAYERS, 4 * HIDDEN)
    packed = pack_layer_params(layers, HEADS)
    pe_buf = make_positional_encoding(MAX_SEQ, HIDDEN)

    out = custom_transformer_forward(input_ids, attention_mask, emb, packed,
                                     pe_buf, num_heads=HEADS)
    out = jax.block_until_ready(out)
    assert out.shape == (B, HIDDEN) and out.dtype == jnp.float32
    assert bool(jnp.all(jnp.isfinite(out)))
    print("KERNEL_OK")
</pallas_src>

<mosaic_0001>
module attributes {stable_mosaic.version = 11 : i64} {
  func.func @fused_encoder_kernel(%arg0: i32, %arg1: i32, %arg2: memref<1x8x256xf32, #tpu.memory_space<vmem>>, %arg3: memref<1x1x8xf32, #tpu.memory_space<vmem>>, %arg4: memref<1x256x256xbf16, #tpu.memory_space<vmem>>, %arg5: memref<1x256x256xbf16, #tpu.memory_space<vmem>>, %arg6: memref<1x256x256xbf16, #tpu.memory_space<vmem>>, %arg7: memref<1x256x256xbf16, #tpu.memory_space<vmem>>, %arg8: memref<1x256x1024xbf16, #tpu.memory_space<vmem>>, %arg9: memref<1x1024x256xbf16, #tpu.memory_space<vmem>>, %arg10: memref<1x9x256xf32, #tpu.memory_space<vmem>>, %arg11: memref<1x1x1024xf32, #tpu.memory_space<vmem>>, %arg12: memref<1x1x256xf32, #tpu.memory_space<vmem>>, %arg13: memref<8x256xf32, #tpu.memory_space<vmem>>) attributes {dimension_semantics = [#tpu.dimension_semantics<parallel>, #tpu.dimension_semantics<arbitrary>], iteration_bounds = array<i64: 2, 2>, scalar_prefetch = 0 : i64, scratch_operands = 1 : i64, tpu.core_type = #tpu.core_type<tc>, window_params = [{transform_indices = @transform_0, window_bounds = array<i64: 1, 8, 256>}, {transform_indices = @transform_1, window_bounds = array<i64: 1, 1, 8>}, {transform_indices = @transform_2, window_bounds = array<i64: 1, 256, 256>}, {transform_indices = @transform_3, window_bounds = array<i64: 1, 256, 256>}, {transform_indices = @transform_4, window_bounds = array<i64: 1, 256, 256>}, {transform_indices = @transform_5, window_bounds = array<i64: 1, 256, 256>}, {transform_indices = @transform_6, window_bounds = array<i64: 1, 256, 1024>}, {transform_indices = @transform_7, window_bounds = array<i64: 1, 1024, 256>}, {transform_indices = @transform_8, window_bounds = array<i64: 1, 9, 256>}, {transform_indices = @transform_9, window_bounds = array<i64: 1, 1, 1024>}, {transform_indices = @transform_10, window_bounds = array<i64: 1, 1, 256>}]} {
    %c0_i32 = arith.constant 0 : i32
    %0 = arith.cmpi eq, %arg1, %c0_i32 : i32
    %1 = arith.extui %0 : i1 to i32
    %c0_i32_0 = arith.constant 0 : i32
    %2 = arith.cmpi ne, %1, %c0_i32_0 : i32
    scf.if %2 {
      %c0_52 = arith.constant 0 : index
      %c0_53 = arith.constant 0 : index
      %c0_54 = arith.constant 0 : index
      %144 = vector.load %arg2[%c0_52, %c0_53, %c0_54] : memref<1x8x256xf32, #tpu.memory_space<vmem>>, vector<1x8x256xf32>
      %145 = vector.shape_cast %144 : vector<1x8x256xf32> to vector<8x256xf32>
      %c0_55 = arith.constant 0 : index
      %c0_56 = arith.constant 0 : index
      %146 = vector.load %arg13[%c0_55, %c0_56] : memref<8x256xf32, #tpu.memory_space<vmem>>, vector<8x256xf32>
      tpu.vector_store %arg13[%c0_55, %c0_56], %145 {strides = array<i32>} : memref<8x256xf32, #tpu.memory_space<vmem>>, vector<8x256xf32>,
    } else {
    }
    %c0 = arith.constant 0 : index
    %c0_1 = arith.constant 0 : index
    %3 = vector.load %arg13[%c0, %c0_1] : memref<8x256xf32, #tpu.memory_space<vmem>>, vector<8x256xf32>
    %c0_2 = arith.constant 0 : index
    %c0_3 = arith.constant 0 : index
    %c0_4 = arith.constant 0 : index
    %4 = vector.load %arg10[%c0_2, %c0_3, %c0_4] : memref<1x9x256xf32, #tpu.memory_space<vmem>>, vector<1x9x256xf32>
    %5 = vector.shape_cast %4 : vector<1x9x256xf32> to vector<9x256xf32>
    %6 = vector.extract_strided_slice %5 {offsets = [0, 0], sizes = [1, 256], strides = [1, 1]} : vector<9x256xf32> to vector<1x256xf32>
    %7 = vector.extract_strided_slice %5 {offsets = [1, 0], sizes = [1, 256], strides = [1, 1]} : vector<9x256xf32> to vector<1x256xf32>
    %8 = vector.extract_strided_slice %5 {offsets = [2, 0], sizes = [1, 256], strides = [1, 1]} : vector<9x256xf32> to vector<1x256xf32>
    %9 = vector.extract_strided_slice %5 {offsets = [3, 0], sizes = [1, 256], strides = [1, 1]} : vector<9x256xf32> to vector<1x256xf32>
    %10 = vector.extract_strided_slice %5 {offsets = [4, 0], sizes = [1, 256], strides = [1, 1]} : vector<9x256xf32> to vector<1x256xf32>
    %11 = vector.extract_strided_slice %5 {offsets = [5, 0], sizes = [1, 256], strides = [1, 1]} : vector<9x256xf32> to vector<1x256xf32>
    %12 = vector.extract_strided_slice %5 {offsets = [6, 0], sizes = [1, 256], strides = [1, 1]} : vector<9x256xf32> to vector<1x256xf32>
    %13 = vector.extract_strided_slice %5 {offsets = [7, 0], sizes = [1, 256], strides = [1, 1]} : vector<9x256xf32> to vector<1x256xf32>
    %14 = vector.extract_strided_slice %5 {offsets = [8, 0], sizes = [1, 256], strides = [1, 1]} : vector<9x256xf32> to vector<1x256xf32>
    %c0_5 = arith.constant 0 : index
    %c0_6 = arith.constant 0 : index
    %c0_7 = arith.constant 0 : index
    %15 = vector.load %arg11[%c0_5, %c0_6, %c0_7] : memref<1x1x1024xf32, #tpu.memory_space<vmem>>, vector<1x1x1024xf32>
    %16 = vector.shape_cast %15 : vector<1x1x1024xf32> to vector<1x1024xf32>
    %c0_8 = arith.constant 0 : index
    %c0_9 = arith.constant 0 : index
    %c0_10 = arith.constant 0 : index
    %17 = vector.load %arg3[%c0_8, %c0_9, %c0_10] : memref<1x1x8xf32, #tpu.memory_space<vmem>>, vector<1x1x8xf32>
    %18 = vector.shape_cast %17 : vector<1x1x8xf32> to vector<1x8xf32>
    %19 = arith.truncf %3 : vector<8x256xf32> to vector<8x256xbf16>
    %c0_11 = arith.constant 0 : index
    %c0_12 = arith.constant 0 : index
    %c0_13 = arith.constant 0 : index
    %20 = vector.load %arg4[%c0_11, %c0_12, %c0_13] : memref<1x256x256xbf16, #tpu.memory_space<vmem>>, vector<1x256x256xbf16>
    %21 = vector.shape_cast %20 : vector<1x256x256xbf16> to vector<256x256xbf16>
    %cst = arith.constant dense<0.000000e+00> : vector<8x256xf32>
    %22 = tpu.matmul %19, %21, %cst {dimension_numbers = #tpu.dot_dimension_numbers<[1], [0], [0], [1], [0, 0, 1, 1], [], []>} : vector<8x256xbf16>, vector<256x256xbf16>, vector<8x256xf32> -> vector<8x256xf32>
    %23 = vector.broadcast %6 : vector<1x256xf32> to vector<8x256xf32>
    %24 = arith.addf %22, %23 : vector<8x256xf32>
    %c0_14 = arith.constant 0 : index
    %c0_15 = arith.constant 0 : index
    %c0_16 = arith.constant 0 : index
    %25 = vector.load %arg5[%c0_14, %c0_15, %c0_16] : memref<1x256x256xbf16, #tpu.memory_space<vmem>>, vector<1x256x256xbf16>
    %26 = vector.shape_cast %25 : vector<1x256x256xbf16> to vector<256x256xbf16>
    %cst_17 = arith.constant dense<0.000000e+00> : vector<8x256xf32>
    %27 = tpu.matmul %19, %26, %cst_17 {dimension_numbers = #tpu.dot_dimension_numbers<[1], [0], [0], [1], [0, 0, 1, 1], [], []>} : vector<8x256xbf16>, vector<256x256xbf16>, vector<8x256xf32> -> vector<8x256xf32>
    %28 = vector.broadcast %7 : vector<1x256xf32> to vector<8x256xf32>
    %29 = arith.addf %27, %28 : vector<8x256xf32>
    %c0_18 = arith.constant 0 : index
    %c0_19 = arith.constant 0 : index
    %c0_20 = arith.constant 0 : index
    %30 = vector.load %arg6[%c0_18, %c0_19, %c0_20] : memref<1x256x256xbf16, #tpu.memory_space<vmem>>, vector<1x256x256xbf16>
    %31 = vector.shape_cast %30 : vector<1x256x256xbf16> to vector<256x256xbf16>
    %cst_21 = arith.constant dense<0.000000e+00> : vector<8x256xf32>
    %32 = tpu.matmul %19, %31, %cst_21 {dimension_numbers = #tpu.dot_dimension_numbers<[1], [0], [0], [1], [0, 0, 1, 1], [], []>} : vector<8x256xbf16>, vector<256x256xbf16>, vector<8x256xf32> -> vector<8x256xf32>
    %33 = vector.broadcast %8 : vector<1x256xf32> to vector<8x256xf32>
    %34 = arith.addf %32, %33 : vector<8x256xf32>
    %35 = arith.truncf %24 : vector<8x256xf32> to vector<8x256xbf16>
    %36 = arith.truncf %29 : vector<8x256xf32> to vector<8x256xbf16>
    %37 = arith.truncf %34 : vector<8x256xf32> to vector<8x256xbf16>
    %38 = vector.extract_strided_slice %35 {offsets = [0, 0], sizes = [8, 128], strides = [1, 1]} : vector<8x256xbf16> to vector<8x128xbf16>
    %39 = vector.extract_strided_slice %35 {offsets = [0, 128], sizes = [8, 128], strides = [1, 1]} : vector<8x256xbf16> to vector<8x128xbf16>
    %40 = vector.shape_cast %38 : vector<8x128xbf16> to vector<1x8x128xbf16>
    %41 = vector.shape_cast %39 : vector<8x128xbf16> to vector<1x8x128xbf16>
    %42 = tpu.concatenate %40, %41 in 0 : vector<1x8x128xbf16>, vector<1x8x128xbf16> -> vector<2x8x128xbf16>
    %43 = vector.extract_strided_slice %36 {offsets = [0, 0], sizes = [8, 128], strides = [1, 1]} : vector<8x256xbf16> to vector<8x128xbf16>
    %44 = vector.extract_strided_slice %36 {offsets = [0, 128], sizes = [8, 128], strides = [1, 1]} : vector<8x256xbf16> to vector<8x128xbf16>
    %45 = vector.shape_cast %43 : vector<8x128xbf16> to vector<1x8x128xbf16>
    %46 = vector.shape_cast %44 : vector<8x128xbf16> to vector<1x8x128xbf16>
    %47 = tpu.concatenate %45, %46 in 0 : vector<1x8x128xbf16>, vector<1x8x128xbf16> -> vector<2x8x128xbf16>
    %48 = vector.extract_strided_slice %37 {offsets = [0, 0], sizes = [8, 128], strides = [1, 1]} : vector<8x256xbf16> to vector<8x128xbf16>
    %49 = vector.extract_strided_slice %37 {offsets = [0, 128], sizes = [8, 128], strides = [1, 1]} : vector<8x256xbf16> to vector<8x128xbf16>
    %50 = vector.shape_cast %48 : vector<8x128xbf16> to vector<1x8x128xbf16>
    %51 = vector.shape_cast %49 : vector<8x128xbf16> to vector<1x8x128xbf16>
    %52 = tpu.concatenate %50, %51 in 0 : vector<1x8x128xbf16>, vector<1x8x128xbf16> -> vector<2x8x128xbf16>
    "tpu.trace_start"() <{level = 10 : i32, message = "hqe,hke->hqk"}> : () -> ()
    %cst_22 = arith.constant dense<0.000000e+00> : vector<2x8x8xf32>
    %53 = tpu.matmul %42, %47, %cst_22 {dimension_numbers = #tpu.dot_dimension_numbers<[2], [2], [1], [1], [0, 0, 0, 1, 1, 1], [0], [0]>} : vector<2x8x128xbf16>, vector<2x8x128xbf16>, vector<2x8x8xf32> -> vector<2x8x8xf32>
    "tpu.trace_stop"() : () -> ()
    %54 = vector.shape_cast %18 : vector<1x8xf32> to vector<1x1x8xf32>
    %55 = vector.broadcast %54 : vector<1x1x8xf32> to vector<2x8x8xf32>
    %56 = arith.addf %53, %55 : vector<2x8x8xf32>
    %cst_23 = arith.constant dense<0xFF800000> : vector<2x8xf32>
    %57 = vector.multi_reduction <maximumf>, %56, %cst_23 [2] : vector<2x8x8xf32> to vector<2x8xf32>
    %58 = vector.shape_cast %57 : vector<2x8xf32> to vector<2x8x1xf32>
    %59 = vector.broadcast %58 : vector<2x8x1xf32> to vector<2x8x8xf32>
    %60 = arith.subf %56, %59 : vector<2x8x8xf32>
    %61 = math.exp %60 : vector<2x8x8xf32>
    %cst_24 = arith.constant dense<0.000000e+00> : vector<2x8xf32>
    %62 = vector.multi_reduction <add>, %61, %cst_24 [2] : vector<2x8x8xf32> to vector<2x8xf32>
    %63 = vector.shape_cast %62 : vector<2x8xf32> to vector<2x8x1xf32>
    %64 = tpu.reciprocal %63 {approx = true} : vector<2x8x1xf32> -> vector<2x8x1xf32>
    %65 = vector.broadcast %64 : vector<2x8x1xf32> to vector<2x8x8xf32>
    %66 = arith.mulf %61, %65 : vector<2x8x8xf32>
    %67 = arith.truncf %66 : vector<2x8x8xf32> to vector<2x8x8xbf16>
    "tpu.trace_start"() <{level = 10 : i32, message = "hqk,hke->hqe"}> : () -> ()
    %cst_25 = arith.constant dense<0.000000e+00> : vector<2x8x128xf32>
    %68 = tpu.matmul %67, %52, %cst_25 {dimension_numbers = #tpu.dot_dimension_numbers<[2], [1], [1], [2], [0, 0, 0, 1, 1, 2], [0], [0]>} : vector<2x8x8xbf16>, vector<2x8x128xbf16>, vector<2x8x128xf32> -> vector<2x8x128xf32>
    "tpu.trace_stop"() : () -> ()
    %69 = vector.extract_strided_slice %68 {offsets = [0, 0, 0], sizes = [1, 8, 128], strides = [1, 1, 1]} : vector<2x8x128xf32> to vector<1x8x128xf32>
    %70 = vector.shape_cast %69 : vector<1x8x128xf32> to vector<8x128xf32>
    %71 = vector.extract_strided_slice %68 {offsets = [1, 0, 0], sizes = [1, 8, 128], strides = [1, 1, 1]} : vector<2x8x128xf32> to vector<1x8x128xf32>
    %72 = vector.shape_cast %71 : vector<1x8x128xf32> to vector<8x128xf32>
    %73 = tpu.concatenate %70, %72 in 1 : vector<8x128xf32>, vector<8x128xf32> -> vector<8x256xf32>
    %74 = arith.truncf %73 : vector<8x256xf32> to vector<8x256xbf16>
    %c0_26 = arith.constant 0 : index
    %c0_27 = arith.constant 0 : index
    %c0_28 = arith.constant 0 : index
    %75 = vector.load %arg7[%c0_26, %c0_27, %c0_28] : memref<1x256x256xbf16, #tpu.memory_space<vmem>>, vector<1x256x256xbf16>
    %76 = vector.shape_cast %75 : vector<1x256x256xbf16> to vector<256x256xbf16>
    %cst_29 = arith.constant dense<0.000000e+00> : vector<8x256xf32>
    %77 = tpu.matmul %74, %76, %cst_29 {dimension_numbers = #tpu.dot_dimension_numbers<[1], [0], [0], [1], [0, 0, 1, 1], [], []>} : vector<8x256xbf16>, vector<256x256xbf16>, vector<8x256xf32> -> vector<8x256xf32>
    %78 = vector.broadcast %9 : vector<1x256xf32> to vector<8x256xf32>
    %79 = arith.addf %77, %78 : vector<8x256xf32>
    %80 = arith.addf %3, %79 : vector<8x256xf32>
    %cst_30 = arith.constant dense<0.000000e+00> : vector<8xf32>
    %81 = vector.multi_reduction <add>, %80, %cst_30 [1] : vector<8x256xf32> to vector<8xf32>
    %82 = vector.shape_cast %81 : vector<8xf32> to vector<8x1xf32>
    %cst_31 = arith.constant 2.560000e+02 : f32
    %83 = vector.broadcast %cst_31 : f32 to vector<8x1xf32>
    %84 = arith.divf %82, %83 : vector<8x1xf32>
    %85 = vector.broadcast %84 : vector<8x1xf32> to vector<8x256xf32>
    %86 = arith.subf %80, %85 : vector<8x256xf32>
    %87 = arith.mulf %86, %86 : vector<8x256xf32>
    %cst_32 = arith.constant dense<0.000000e+00> : vector<8xf32>
    %88 = vector.multi_reduction <add>, %87, %cst_32 [1] : vector<8x256xf32> to vector<8xf32>
    %89 = vector.shape_cast %88 : vector<8xf32> to vector<8x1xf32>
    %cst_33 = arith.constant 2.560000e+02 : f32
    %90 = vector.broadcast %cst_33 : f32 to vector<8x1xf32>
    %91 = arith.divf %89, %90 : vector<8x1xf32>
    %92 = vector.broadcast %84 : vector<8x1xf32> to vector<8x256xf32>
    %93 = arith.subf %80, %92 : vector<8x256xf32>
    %cst_34 = arith.constant 9.99999974E-6 : f32
    %94 = vector.broadcast %cst_34 : f32 to vector<8x1xf32>
    %95 = arith.addf %91, %94 : vector<8x1xf32>
    %96 = math.rsqrt %95 : vector<8x1xf32>
    %97 = vector.broadcast %96 : vector<8x1xf32> to vector<8x256xf32>
    %98 = arith.mulf %93, %97 : vector<8x256xf32>
    %99 = vector.broadcast %11 : vector<1x256xf32> to vector<8x256xf32>
    %100 = arith.mulf %98, %99 : vector<8x256xf32>
    %101 = vector.broadcast %12 : vector<1x256xf32> to vector<8x256xf32>
    %102 = arith.addf %100, %101 : vector<8x256xf32>
    %103 = arith.truncf %102 : vector<8x256xf32> to vector<8x256xbf16>
    %c0_35 = arith.constant 0 : index
    %c0_36 = arith.constant 0 : index
    %c0_37 = arith.constant 0 : index
    %104 = vector.load %arg8[%c0_35, %c0_36, %c0_37] : memref<1x256x1024xbf16, #tpu.memory_space<vmem>>, vector<1x256x1024xbf16>
    %105 = vector.shape_cast %104 : vector<1x256x1024xbf16> to vector<256x1024xbf16>
    %cst_38 = arith.constant dense<0.000000e+00> : vector<8x1024xf32>
    %106 = tpu.matmul %103, %105, %cst_38 {dimension_numbers = #tpu.dot_dimension_numbers<[1], [0], [0], [1], [0, 0, 1, 1], [], []>} : vector<8x256xbf16>, vector<256x1024xbf16>, vector<8x1024xf32> -> vector<8x1024xf32>
    %107 = vector.broadcast %16 : vector<1x1024xf32> to vector<8x1024xf32>
    %108 = arith.addf %106, %107 : vector<8x1024xf32>
    %cst_39 = arith.constant 0.000000e+00 : f32
    %109 = vector.broadcast %cst_39 : f32 to vector<8x1024xf32>
    %110 = arith.maximumf %108, %109 : vector<8x1024xf32>
    %111 = arith.truncf %110 : vector<8x1024xf32> to vector<8x1024xbf16>
    %c0_40 = arith.constant 0 : index
    %c0_41 = arith.constant 0 : index
    %c0_42 = arith.constant 0 : index
    %112 = vector.load %arg9[%c0_40, %c0_41, %c0_42] : memref<1x1024x256xbf16, #tpu.memory_space<vmem>>, vector<1x1024x256xbf16>
    %113 = vector.shape_cast %112 : vector<1x1024x256xbf16> to vector<1024x256xbf16>
    %cst_43 = arith.constant dense<0.000000e+00> : vector<8x256xf32>
    %114 = tpu.matmul %111, %113, %cst_43 {dimension_numbers = #tpu.dot_dimension_numbers<[1], [0], [0], [1], [0, 0, 1, 1], [], []>} : vector<8x1024xbf16>, vector<1024x256xbf16>, vector<8x256xf32> -> vector<8x256xf32>
    %115 = vector.broadcast %10 : vector<1x256xf32> to vector<8x256xf32>
    %116 = arith.addf %114, %115 : vector<8x256xf32>
    %117 = arith.addf %102, %116 : vector<8x256xf32>
    %cst_44 = arith.constant dense<0.000000e+00> : vector<8xf32>
    %118 = vector.multi_reduction <add>, %117, %cst_44 [1] : vector<8x256xf32> to vector<8xf32>
    %119 = vector.shape_cast %118 : vector<8xf32> to vector<8x1xf32>
    %cst_45 = arith.constant 2.560000e+02 : f32
    %120 = vector.broadcast %cst_45 : f32 to vector<8x1xf32>
    %121 = arith.divf %119, %120 : vector<8x1xf32>
    %122 = vector.broadcast %121 : vector<8x1xf32> to vector<8x256xf32>
    %123 = arith.subf %117, %122 : vector<8x256xf32>
    %124 = arith.mulf %123, %123 : vector<8x256xf32>
    %cst_46 = arith.constant dense<0.000000e+00> : vector<8xf32>
    %125 = vector.multi_reduction <add>, %124, %cst_46 [1] : vector<8x256xf32> to vector<8xf32>
    %126 = vector.shape_cast %125 : vector<8xf32> to vector<8x1xf32>
    %cst_47 = arith.constant 2.560000e+02 : f32
    %127 = vector.broadcast %cst_47 : f32 to vector<8x1xf32>
    %128 = arith.divf %126, %127 : vector<8x1xf32>
    %129 = vector.broadcast %121 : vector<8x1xf32> to vector<8x256xf32>
    %130 = arith.subf %117, %129 : vector<8x256xf32>
    %cst_48 = arith.constant 9.99999974E-6 : f32
    %131 = vector.broadcast %cst_48 : f32 to vector<8x1xf32>
    %132 = arith.addf %128, %131 : vector<8x1xf32>
    %133 = math.rsqrt %132 : vector<8x1xf32>
    %134 = vector.broadcast %133 : vector<8x1xf32> to vector<8x256xf32>
    %135 = arith.mulf %130, %134 : vector<8x256xf32>
    %136 = vector.broadcast %13 : vector<1x256xf32> to vector<8x256xf32>
    %137 = arith.mulf %135, %136 : vector<8x256xf32>
    %138 = vector.broadcast %14 : vector<1x256xf32> to vector<8x256xf32>
    %139 = arith.addf %137, %138 : vector<8x256xf32>
    %c0_49 = arith.constant 0 : index
    %c0_50 = arith.constant 0 : index
    %140 = vector.load %arg13[%c0_49, %c0_50] : memref<8x256xf32, #tpu.memory_space<vmem>>, vector<8x256xf32>
    tpu.vector_store %arg13[%c0_49, %c0_50], %139 {strides = array<i32>} : memref<8x256xf32, #tpu.memory_space<vmem>>, vector<8x256xf32>,
    %c1_i32 = arith.constant 1 : i32
    %141 = arith.cmpi eq, %arg1, %c1_i32 : i32
    %142 = arith.extui %141 : i1 to i32
    %c0_i32_51 = arith.constant 0 : i32
    %143 = arith.cmpi ne, %142, %c0_i32_51 : i32
    scf.if %143 {
      %144 = vector.extract_strided_slice %139 {offsets = [0, 0], sizes = [1, 256], strides = [1, 1]} : vector<8x256xf32> to vector<1x256xf32>
      %145 = vector.shape_cast %144 : vector<1x256xf32> to vector<1x1x256xf32>
      %c0_52 = arith.constant 0 : index
      %c0_53 = arith.constant 0 : index
      %c0_54 = arith.constant 0 : index
      %146 = vector.load %arg12[%c0_52, %c0_53, %c0_54] : memref<1x1x256xf32, #tpu.memory_space<vmem>>, vector<1x1x256xf32>
      tpu.vector_store %arg12[%c0_52, %c0_53, %c0_54], %145 {strides = array<i32>} : memref<1x1x256xf32, #tpu.memory_space<vmem>>, vector<1x1x256xf32>,
    } else {
    }
    return
  }
  func.func @transform_0(%arg0: i32, %arg1: i32) -> (i32, i32, i32) {
    %c0_i32 = arith.constant 0 : i32
    %c0_i32_0 = arith.constant 0 : i32
    %c0_i32_1 = arith.constant 0 : i32
    return %arg0, %c0_i32, %c0_i32_0 : i32, i32, i32
  }
  func.func @transform_1(%arg0: i32, %arg1: i32) -> (i32, i32, i32) {
    %c0_i32 = arith.constant 0 : i32
    %c0_i32_0 = arith.constant 0 : i32
    %c0_i32_1 = arith.constant 0 : i32
    return %arg0, %c0_i32, %c0_i32_0 : i32, i32, i32
  }
  func.func @transform_2(%arg0: i32, %arg1: i32) -> (i32, i32, i32) {
    %c0_i32 = arith.constant 0 : i32
    %c0_i32_0 = arith.constant 0 : i32
    %c0_i32_1 = arith.constant 0 : i32
    return %arg1, %c0_i32, %c0_i32_0 : i32, i32, i32
  }
  func.func @transform_3(%arg0: i32, %arg1: i32) -> (i32, i32, i32) {
    %c0_i32 = arith.constant 0 : i32
    %c0_i32_0 = arith.constant 0 : i32
    %c0_i32_1 = arith.constant 0 : i32
    return %arg1, %c0_i32, %c0_i32_0 : i32, i32, i32
  }
  func.func @transform_4(%arg0: i32, %arg1: i32) -> (i32, i32, i32) {
    %c0_i32 = arith.constant 0 : i32
    %c0_i32_0 = arith.constant 0 : i32
    %c0_i32_1 = arith.constant 0 : i32
    return %arg1, %c0_i32, %c0_i32_0 : i32, i32, i32
  }
  func.func @transform_5(%arg0: i32, %arg1: i32) -> (i32, i32, i32) {
    %c0_i32 = arith.constant 0 : i32
    %c0_i32_0 = arith.constant 0 : i32
    %c0_i32_1 = arith.constant 0 : i32
    return %arg1, %c0_i32, %c0_i32_0 : i32, i32, i32
  }
  func.func @transform_6(%arg0: i32, %arg1: i32) -> (i32, i32, i32) {
    %c0_i32 = arith.constant 0 : i32
    %c0_i32_0 = arith.constant 0 : i32
    %c0_i32_1 = arith.constant 0 : i32
    return %arg1, %c0_i32, %c0_i32_0 : i32, i32, i32
  }
  func.func @transform_7(%arg0: i32, %arg1: i32) -> (i32, i32, i32) {
    %c0_i32 = arith.constant 0 : i32
    %c0_i32_0 = arith.constant 0 : i32
    %c0_i32_1 = arith.constant 0 : i32
    return %arg1, %c0_i32, %c0_i32_0 : i32, i32, i32
  }
  func.func @transform_8(%arg0: i32, %arg1: i32) -> (i32, i32, i32) {
    %c0_i32 = arith.constant 0 : i32
    %c0_i32_0 = arith.constant 0 : i32
    %c0_i32_1 = arith.constant 0 : i32
    return %arg1, %c0_i32, %c0_i32_0 : i32, i32, i32
  }
  func.func @transform_9(%arg0: i32, %arg1: i32) -> (i32, i32, i32) {
    %c0_i32 = arith.constant 0 : i32
    %c0_i32_0 = arith.constant 0 : i32
    %c0_i32_1 = arith.constant 0 : i32
    return %arg1, %c0_i32, %c0_i32_0 : i32, i32, i32
  }
  func.func @transform_10(%arg0: i32, %arg1: i32) -> (i32, i32, i32) {
    %c0_i32 = arith.constant 0 : i32
    %c0_i32_0 = arith.constant 0 : i32
    %c0_i32_1 = arith.constant 0 : i32
    return %arg0, %c0_i32, %c0_i32_0 : i32, i32, i32
  }
}

</mosaic_0001>

<bundles_post_ra>
// kernel: tpu_custom_call.1
= control target key start
LH: loop header
LB: loop body
LE: loop exit
PB: predicated region body
PF: predicated region fallthrough
CT: control target
= control target key end

     0   :  { %s6400_s0 = inlined_call_operand.vmem [shape: f32[2,8,256], index: 0, kind: input, shape index: {}]   ;;  %s6401_s1 = inlined_call_operand.vmem [shape: f32[2,1,8], index: 1, kind: input, shape index: {}]   ;;  %s6402_s2 = inlined_call_operand.hbm [shape: bf16[2,256,256], index: 2, kind: input, shape index: {}]   ;;  %s6403_s3 = inlined_call_operand.hbm [shape: bf16[2,256,256], index: 3, kind: input, shape index: {}]   ;;  %s6404_s4 = inlined_call_operand.hbm [shape: bf16[2,256,256], index: 4, kind: input, shape index: {}]   ;;  %s6405_s5 = inlined_call_operand.hbm [shape: bf16[2,256,256], index: 5, kind: input, shape index: {}]   ;;  %s6406_s6 = inlined_call_operand.hbm [shape: bf16[2,256,1024], index: 6, kind: input, shape index: {}]   ;;  %s6407_s7 = inlined_call_operand.hbm [shape: bf16[2,1024,256], index: 7, kind: input, shape index: {}]   ;;  %s6408_s8 = inlined_call_operand.vmem [shape: f32[2,9,256], index: 8, kind: input, shape index: {}]   ;;  %s6409_s9 = inlined_call_operand.vmem [shape: f32[2,1,1024], index: 9, kind: input, shape index: {}]   ;;  %s6410_s10 = inlined_call_operand.hbm [shape: f32[2,1,256], index: 10, kind: output, shape index: {}]  }
   0x1   :  { %6431 = sst [smem:[#allocation36_spill]] %s6400_s0 }
   0x2   :  { %6432 = sst [smem:[#allocation37_spill]] %s6401_s1 }
   0x3   :  { %6433 = sst [smem:[#allocation38_spill]] %s6402_s2 }
   0x4   :  { %6434 = sst [smem:[#allocation39_spill]] %s6403_s3 }
   0x5   :  { %6435 = sst [smem:[#allocation40_spill]] %s6404_s4 }
   0x6   :  { %6436 = sst [smem:[#allocation41_spill]] %s6405_s5 }
   0x7   :  { %6437 = sst [smem:[#allocation42_spill]] %s6406_s6 }
   0x8   :  { %6438 = sst [smem:[#allocation43_spill]] %s6407_s7 }
   0x9   :  { %6439 = sst [smem:[#allocation44_spill]] %s6408_s8 }
   0xa   :  { %6440 = sst [smem:[#allocation45_spill]] %s6409_s9 }
   0xb   :  { %6441 = sst [smem:[#allocation46_spill]] %s6410_s10 }
   0xc   :  { %15 = vsyncpa [#allocation4], 0 }
   0xd   :  { %17 = vsyncpa [#allocation4 + $0x1], 0 }
   0xe   :  { %18 = vsyncpa [#allocation7], 0 }
   0xf   :  { %20 = vsyncpa [#allocation7 + $0x1], 0 }
  0x10   :  { %21 = vsyncpa [#allocation10], 0 }
  0x11   :  { %23 = vsyncpa [#allocation10 + $0x1], 0 }
  0x12   :  { %24 = vsyncpa [#allocation13], 0 }
  0x13   :  { %26 = vsyncpa [#allocation13 + $0x1], 0 }
  0x14   :  { %27 = vsyncpa [#allocation5], 0 }
  0x15   :  { %29 = vsyncpa [#allocation5 + $0x1], 0  ;;  %s5512_s13 = smov 0   ;;  %s5514_s14 = smov 0  }
  0x16   :  { %s5516_s15 = smov 0   ;;  %s5518_s16 = smov 0  }
  0x17   :  { %s5520_s17 = smov 0   ;;  %s5522_s18 = smov 0  }
  0x18   :  { %s5524_s19 = smov 0   ;;  %s5526_s20 = smov 0  }
  0x19   :  { %s5528_s21 = smov 0   ;;  %s5530_s22 = smov 0  }
  0x1a   :  { %s5532_s23 = smov 0  }
  0x1b LB: > { %6442 = sst [smem:[#allocation20_spill]] %s5401_s13  ;;  %s5566_s24 = sadd.s32 4294967295, %s5441_s23   ;;  %s5441_s23 = sphi %s5532_s23, %s35_s23   ;;  %s5437_s22 = sphi %s5530_s22, %s6499_s22   ;;  %s5433_s21 = sphi %s5528_s21, %s6498_s21   ;;  %s5429_s20 = sphi %s5526_s20, %s6497_s20   ;;  %s5425_s19 = sphi %s5524_s19, %s6496_s19   ;;  %s5421_s18 = sphi %s5522_s18, %s6495_s18   ;;  %s5417_s17 = sphi %s5520_s17, %s6501_s17   ;;  %s5413_s16 = sphi %s5518_s16, %s6500_s16   ;;  %s5409_s15 = sphi %s5516_s15, %s6493_s15   ;;  %s5405_s14 = sphi %s5514_s14, %s6492_s14   ;;  %s5401_s13 = sphi %s5512_s13, %s6491_s13  }
  0x1c   : > { %6443 = sst [smem:[#allocation21_spill]] %s5405_s14  ;;  %s4138_s25 = sadd.s32 4294967294, %s5441_s23  }
  0x1d   : > { %6444 = sst [smem:[#allocation22_spill]] %s5409_s15  ;;  %s44_s26 = sadd.s32 1, %s5433_s21 }
  0x1e   : > { %6445 = sst [smem:[#allocation23_spill]] %s5421_s18  ;;  %s47_s27 = sadd.s32 1, %s5437_s22 }
  0x1f   : > { %6446 = sst [smem:[#allocation24_spill]] %s5425_s19  ;;  %p45_p0 = scmp.ge.s32.totalorder %s44_s26, 2 }
  0x20   : > { %6447 = sst [smem:[#allocation25_spill]] %s5429_s20  ;;  %s106_s28 = sadd.s32 1, %s5421_s18 }
  0x21   : > { %6448 = sst [smem:[#allocation26_spill]] %s5433_s21  ;;  %p113_p1 = scmp.ne.s32.totalorder %s5421_s18, %s5417_s17 }
  0x22   : > { %6449 = sst [smem:[#allocation27_spill]] %s5437_s22  ;;  %p114_p2 = scmp.eq.s32.totalorder %s5441_s23, 0 }
  0x23   : > { %6450 = sst [smem:[#allocation28_spill]] %s5441_s23  ;;  %s6503_s26 = smov (%p45_p0, %s44_s26), 0 }
  0x24   : > { %6451 = sst [smem:[#allocation29_spill]] %s5566_s24  ;;  %s6505_s27 = smov (!%p45_p0, %s47_s27), %s5437_s22 }
  0x25   : > { %6452 = sst [smem:[#allocation30_spill]] %s6503_s26  ;;  %s103_s29 = ssub.s32 %s5433_s21, %s6503_s26 }
  0x26   : > { %p5580_p3 = por %p114_p2, %p113_p1  ;;  %p49_p4 = scmp.ge.s32.totalorder %s6505_s27, 2 }
  0x27   : > { %p104_p5 = scmp.eq.s32.totalorder %s103_s29, 0  ;;  %p119_p6 = scmp.ne.s32.totalorder %s5417_s17, %s5413_s16 }
  0x28   : > { %p120_p7 = scmp.eq.s32.totalorder %s5566_s24, 0  ;;  %s6507_s27 = smov (%p49_p4, %s6505_s27), 0 }
  0x29   : > { %6454 = sst [smem:[#allocation31_spill]] %s6507_s27  ;;  %s311_s26 = ssub.s32 %s5437_s22, %s6507_s27 }
  0x2a   : > { %s5589_s11 = scalar_select %p104_p5, %s5421_s18, %s106_s28  }
  0x2b   : > { %p5591_p8 = por %p120_p7, %p119_p6  ;;  %p312_p9 = scmp.eq.s32.totalorder %s311_s26, 0 }
  0x2c   : > { %6455 = sst [smem:[#allocation32_spill]] %s5589_s11  ;;  %s314_s10 = sadd.s32 1, %s5409_s15 }
  0x2d   : > { %p324_p10 = scmp.ne.s32.totalorder %s5409_s15, %s5405_s14  ;;  %p325_p11 = scmp.eq.s32.totalorder %s5566_s24, 3 }
  0x2e   : > { %s5602_s16 = scalar_select %p312_p9, %s5409_s15, %s314_s10  }
  0x2f   : > { %p5604_p12 = por %p325_p11, %p324_p10  ;;  %p330_p13 = scmp.ne.s32.totalorder %s5405_s14, %s5401_s13 }
  0x30   : > { %6457 = sst [smem:[#allocation33_spill]] %s5602_s16  ;;  %p331_p0 = scmp.eq.s32.totalorder %s4138_s25, 3 }
  0x31   : > { %s6458_s29 = scalar_select %p5604_p12, 1, 0 }
  0x32   : > { %p4646_p1 = scmp.lt.s32.totalorder %s5441_s23, 4  ;;  %s5612_s28 = sand.u32 1, %s5421_s18  }
  0x33   : > { %6459 = sst [smem:[#allocation34_spill]] %s6458_s29  ;;  %p5614_p2 = por %p331_p0, %p330_p13 }
  0x34   : > { %s5619_s26 = sshll.u32 %s5612_s28, 8  ;;  %s5622_s10 = sshll.u32 %s5433_s21, 12 }
  0x35   : > { %s6460_s27 = scalar_select %p5614_p2, 1, 0 }
  0x36   : > { %p5626_p4 = pnand %p4646_p1, %p5580_p3  ;;  %s6421_s25 = sand.u32 1, %s5441_s23  }
  0x37   : > { %6461 = sst [smem:[#allocation35_spill]] %s6460_s27  ;;  %s390_s15 = scalar_lea.vmem [#allocation6], %s5619_s26 }
  0x38   : > { %s6463_s3 = sld [smem:[#allocation39_spill]]  ;;  %s397_s13 = sshll.u32 %s390_s15, 4  ;;  %s398_s13 = int_to_ptr.vmem [resolvable:$true] %s397_s13 }
  0x39   : > { %p4159_p5 = scmp.ge.s32.totalorder %s5441_s23, 1  ;;  %s5639_s27 = scalar_lea.sflag [#allocation7], %s6421_s25 }
  0x3a   : > { %p5643_p6 = pneg %p5626_p4  ;;  %s5154_s29 = scalar_lea.vmem %s398_s13, 4096 }
  0x3b   : > { %p5155_p3 = scmp.ne.s32.totalorder %s398_s13, %s5154_s29  ;;  %s5443_s18 = smov [#allocation6]  }
  0x3c   : > { %s5159_s11 = sshll.u32 %s5443_s18, 4  ;;  %s5160_s11 = int_to_ptr.vmem [resolvable:$false] %s5159_s11 }
  0x3d   : > { %p5157_p7 = pnand %p5155_p3, %p5643_p6  ;;  %s5161_s15 = scalar_lea.vmem %s5160_s11, 8192 }
  0x3e   : > { %s396_s16 = scalar_lea.hbm %s6463_s3, %s5622_s10  ;;  %p5162_p10 = scmp.lt.s32.totalorder %s398_s13, %s5160_s11 }
  0x3f   : > { %p5158_p9 = pneg %p5157_p7  ;;  %p5163_p11 = scmp.lt.s32.totalorder %s5161_s15, %s5154_s29 }
  0x41   : > { %p5164_p13 = por %p5163_p11, %p5162_p10 }
  0x43   : > { %p5165_p0 = pnand %p5164_p13, %p5158_p9 }
  0x45   : > { %5168 = shalt.err (!%p5165_p0)
}
  0x46   : > { %s5444_s25 = smov 128   ;;  %s5445_s3 = smov 8  }
  0x47   : > { %4629 = dma.hbm_to_vmem [thread:$0]  (!%p5626_p4), %s396_s16, 4096, %s398_s13, %s5639_s27, %s5444_s25, %s5444_s25, %s5445_s3  }
  0x48   : > { %p504_p1 = scmp.lt.s32.totalorder %s5441_s23, 5  ;;  %s6465_s5 = sld [smem:[#allocation41_spill]] }
  0x49   : > { %s432_s9 = scalar_lea.vmem [#allocation9], %s5619_s26  ;;  %s6467_s0 = sand.u32 1, %s5441_s23  }
  0x4a   : > { %p5662_p3 = pnand %p4159_p5, %p504_p1  ;;  %s439_s8 = sshll.u32 %s432_s9, 4  ;;  %s440_s8 = int_to_ptr.vmem [resolvable:$true] %s439_s8 }
  0x4b   : > { %s5669_s1 = scalar_lea.sflag [#allocation10], %s6467_s0  ;;  %s5182_s19 = scalar_lea.vmem %s440_s8, 4096 }
  0x4c   : > { %p5183_p7 = scmp.ne.s32.totalorder %s440_s8, %s5182_s19  ;;  %s5446_s13 = smov [#allocation9]  }
  0x4d   : > { %s5187_s16 = sshll.u32 %s5446_s13, 4  ;;  %s5188_s16 = int_to_ptr.vmem [resolvable:$false] %s5187_s16 }
  0x4e   : > { %s438_s11 = scalar_lea.hbm %s6465_s5, %s5622_s10  ;;  %p5185_p9 = pnand %p5183_p7, %p5643_p6 }
  0x4f   : > { %s5189_s29 = scalar_lea.vmem %s5188_s16, 8192  ;;  %p5190_p11 = scmp.lt.s32.totalorder %s440_s8, %s5188_s16 }
  0x50   : > { %p5186_p10 = pneg %p5185_p9  ;;  %p5191_p5 = scmp.lt.s32.totalorder %s5189_s29, %s5182_s19 }
  0x52   : > { %p5192_p13 = por %p5191_p5, %p5190_p11 }
  0x54   : > { %p5193_p0 = pnand %p5192_p13, %p5186_p10 }
  0x56   : > { %5196 = shalt.err (!%p5193_p0)
}
  0x57   : > { %4635 = dma.hbm_to_vmem [thread:$0]  (!%p5626_p4), %s438_s11, 4096, %s440_s8, %s5669_s1, %s5444_s25, %s5444_s25, %s5445_s3  }
  0x58   : > { %s6468_s2 = sld [smem:[#allocation38_spill]]  ;;  %s369_s19 = scalar_lea.vmem [#allocation3], %s5619_s26 }
  0x59   : > { %s376_s13 = sshll.u32 %s369_s19, 4  ;;  %s6469_s4 = sld [smem:[#allocation40_spill]]  ;;  %s377_s13 = int_to_ptr.vmem [resolvable:$true] %s376_s13 }
  0x5a   : > { %s366_s23 = scalar_lea.sflag [#allocation4], %s5612_s28  ;;  %s5210_s20 = scalar_lea.vmem %s377_s13, 4096 }
  0x5b   : > { %p5211_p1 = scmp.ne.s32.totalorder %s377_s13, %s5210_s20  ;;  %s5447_s14 = smov [#allocation3]  }
  0x5c   : > { %s5215_s24 = sshll.u32 %s5447_s14, 4  ;;  %s5216_s24 = int_to_ptr.vmem [resolvable:$false] %s5215_s24 }
  0x5d   : > { %p5213_p7 = pnand %p5211_p1, %p5643_p6  ;;  %s5217_s8 = scalar_lea.vmem %s5216_s24, 8192 }
  0x5e   : > { %s375_s18 = scalar_lea.hbm %s6468_s2, %s5622_s10  ;;  %p5218_p10 = scmp.lt.s32.totalorder %s377_s13, %s5216_s24 }
  0x5f   : > { %s417_s5 = scalar_lea.hbm %s6469_s4, %s5622_s10  ;;  %p5214_p9 = pneg %p5213_p7 }
  0x60   : > { %p5219_p11 = scmp.lt.s32.totalorder %s5217_s8, %s5210_s20 }
  0x62   : > { %p5220_p5 = por %p5219_p11, %p5218_p10 }
  0x64   : > { %p5221_p13 = pnand %p5220_p5, %p5214_p9 }
  0x66   : > { %5224 = shalt.err (!%p5221_p13)
}
  0x67   : > { %4626 = dma.hbm_to_vmem [thread:$0]  (!%p5626_p4), %s375_s18, 4096, %s377_s13, %s366_s23, %s5444_s25, %s5444_s25, %s5445_s3  }
  0x68   : > { %s411_s11 = scalar_lea.vmem [#allocation8], %s5619_s26  ;;  %s4153_s9 = sshll.u32 %s5612_s28, 10 }
  0x69   : > { %s418_s0 = sshll.u32 %s411_s11, 4  ;;  %s5448_s20 = smov [#allocation8]   ;;  %s419_s0 = int_to_ptr.vmem [resolvable:$true] %s418_s0 }
  0x6a   : > { %s5238_s14 = scalar_lea.vmem %s419_s0, 4096  ;;  %s5243_s24 = sshll.u32 %s5448_s20, 4  ;;  %s5244_s24 = int_to_ptr.vmem [resolvable:$false] %s5243_s24 }
  0x6b   : > { %p5239_p0 = scmp.ne.s32.totalorder %s419_s0, %s5238_s14  ;;  %s5245_s19 = scalar_lea.vmem %s5244_s24, 8192 }
  0x6c   : > { %p5246_p9 = scmp.lt.s32.totalorder %s419_s0, %s5244_s24  ;;  %p5247_p10 = scmp.lt.s32.totalorder %s5245_s19, %s5238_s14 }
  0x6d   : > { %p5241_p1 = pnand %p5239_p0, %p5643_p6 }
  0x6e   : > { %p5248_p11 = por %p5247_p10, %p5246_p9 }
  0x6f   : > { %p5242_p7 = pneg %p5241_p1 }
  0x71   : > { %p5249_p5 = pnand %p5248_p11, %p5242_p7 }
  0x73   : > { %5252 = shalt.err (!%p5249_p5)
}
  0x74   : > { %4632 = dma.hbm_to_vmem [thread:$0]  (!%p5626_p4), %s417_s5, 4096, %s419_s0, %s5639_s27, %s5444_s25, %s5444_s25, %s5445_s3  }
  0x75   : > { %s4572_s18 = sshll.u32 %s5433_s21, 14  ;;  %s453_s13 = scalar_lea.vmem [#allocation11], %s4153_s9 }
  0x76   : > { %s460_s16 = sshll.u32 %s453_s13, 4  ;;  %s6470_s6 = sld [smem:[#allocation42_spill]]  ;;  %s461_s16 = int_to_ptr.vmem [resolvable:$true] %s460_s16 }
  0x77   : > { %s5266_s14 = scalar_lea.vmem %s461_s16, 16384  ;;  %s5449_s20 = smov [#allocation11]  }
  0x78   : > { %p5267_p13 = scmp.ne.s32.totalorder %s461_s16, %s5266_s14  ;;  %s5271_s10 = sshll.u32 %s5449_s20, 4  ;;  %s5272_s10 = int_to_ptr.vmem [resolvable:$false] %s5271_s10 }
  0x79   : > { %s5273_s24 = scalar_lea.vmem %s5272_s10, 32768  ;;  %p5274_p7 = scmp.lt.s32.totalorder %s461_s16, %s5272_s10 }
  0x7a   : > { %p5269_p0 = pnand %p5267_p13, %p5643_p6  ;;  %p5275_p9 = scmp.lt.s32.totalorder %s5273_s24, %s5266_s14 }
  0x7c   : > { %s459_s11 = scalar_lea.hbm %s6470_s6, %s4572_s18  ;;  %p5270_p1 = pneg %p5269_p0 }
  0x7d   : > { %p5276_p10 = por %p5275_p9, %p5274_p7 }
  0x7f   : > { %p5277_p11 = pnand %p5276_p10, %p5270_p1 }
  0x81   : > { %5280 = shalt.err (!%p5277_p11)
}
  0x82   : > { %s5450_s5 = smov 512   ;;  %s5451_s27 = smov 32  }
  0x83   : > { %4638 = dma.hbm_to_vmem [thread:$0]  (!%p5626_p4), %s459_s11, 16384, %s461_s16, %s5669_s1, %s5450_s5, %s5450_s5, %s5451_s27  }
  0x84   : > { %s6471_s7 = sld [smem:[#allocation43_spill]]  ;;  %s474_s26 = scalar_lea.vmem [#allocation12], %s4153_s9 }
  0x85   : > { %s481_s13 = sshll.u32 %s474_s26, 4  ;;  %s471_s29 = scalar_lea.sflag [#allocation13], %s5612_s28  ;;  %s482_s13 = int_to_ptr.vmem [resolvable:$true] %s481_s13 }
  0x86   : > { %s5294_s8 = scalar_lea.vmem %s482_s13, 16384  ;;  %s5452_s14 = smov [#allocation12]  }
  0x87   : > { %p5295_p5 = scmp.ne.s32.totalorder %s482_s13, %s5294_s8  ;;  %s5299_s20 = sshll.u32 %s5452_s14, 4  ;;  %s5300_s20 = int_to_ptr.vmem [resolvable:$false] %s5299_s20 }
  0x88   : > { %s5301_s10 = scalar_lea.vmem %s5300_s20, 32768  ;;  %p5302_p1 = scmp.lt.s32.totalorder %s482_s13, %s5300_s20 }
  0x89   : > { %p5297_p13 = pnand %p5295_p5, %p5643_p6  ;;  %p5303_p7 = scmp.lt.s32.totalorder %s5301_s10, %s5294_s8 }
  0x8a   : > { %s480_s23 = scalar_lea.hbm %s6471_s7, %s4572_s18 }
  0x8b   : > { %p5298_p0 = pneg %p5297_p13  ;;  %p5304_p9 = por %p5303_p7, %p5302_p1 }
  0x8d   : > { %p5305_p10 = pnand %p5304_p9, %p5298_p0 }
  0x8f   : > { %5308 = shalt.err (!%p5305_p10)
}
  0x90   : > { %4641 = dma.hbm_to_vmem [thread:$0]  (!%p5626_p4), %s480_s23, 16384, %s482_s13, %s471_s29, %s5444_s25, %s5444_s25, %s5445_s3  }
  0x91   : > { %508 = sbr.rel (%p5662_p3) target bundleno = 2496 (0x9c0), region = 60  ;;  %s510_s1 = sand.u32 (!%p5662_p3), 1, %s5417_s17  }
  0x92   : > { %s4160_s28 = sshll.u32 (!%p5662_p3), %s510_s1, 8  ;;  %s511_s30 = scalar_lea.sflag (!%p5662_p3), [#allocation4], %s510_s1 }
  0x93   : > { %s5738_s9 = scalar_lea.vmem (!%p5662_p3), [#allocation3], %s4160_s28 }
  0x96   : > { %5380 = dma.done.wait (%p5591_p8), %s511_s30, 4096  }
  0x97   : > { %5382 = vsyncadd (%p5591_p8), %s511_s30, 4294963200  ;;  %s6472_s22 = sld [smem:[#allocation29_spill]]  ;;  %s5745_s3 = scalar_lea.vmem [#allocation6], %s4160_s28 }
  0x9d   : > { %s519_s18 = sand.u32 1, %s6472_s22  }
  0x9e   : > { %s520_s16 = scalar_lea.sflag [#allocation7], %s519_s18 }
  0x9f   : > { %5384 = dma.done.wait (%p5591_p8), %s520_s16, 8192  }
  0xa0   : > { %5386 = vsyncadd (%p5591_p8), %s520_s16, 4294959104  ;;  %s5751_s25 = scalar_lea.vmem [#allocation8], %s4160_s28  ;;  %s538_s15 = scalar_lea.sflag [#allocation10], %s519_s18 }
  0xa1   : > { %s5753_s11 = scalar_lea.vmem [#allocation9], %s4160_s28 }
  0xa2   : > { %5388 = dma.done.wait (%p5591_p8), %s538_s15, 20480  }
  0xa3   : > { %5390 = vsyncadd (%p5591_p8), %s538_s15, 4294946816  ;;  %s4164_s24 = sshll.u32 %s510_s1, 10  ;;  %s556_s27 = scalar_lea.sflag [#allocation13], %s510_s1 }
  0xa4   : > { %s5759_s5 = scalar_lea.vmem [#allocation11], %s4164_s24  ;;  %s5761_s0 = scalar_lea.vmem [#allocation12], %s4164_s24 }
  0xa5   : > { %5392 = dma.done.wait (%p5591_p8), %s556_s27, 16384  }
  0xa6   : > { %5394 = vsyncadd (%p5591_p8), %s556_s27, 4294950912  ;;  %s6473_s19 = sld [smem:[#allocation21_spill]] }
  0xa7   : > { %s6474_s23 = sld [smem:[#allocation25_spill]] }
  0xa8   : > { %s6475_s26 = sld [smem:[#allocation24_spill]] }
  0xa9   : > { %s6476_s10 = sld [smem:[#allocation37_spill]] }
  0xaa   : > { %s6477_s22 = sld [smem:[#allocation36_spill]] }
  0xab   : > { %s6478_s27 = sld [smem:[#allocation44_spill]] }
  0xac   : > { %s6429_s13 = sand.u32 1, %s6473_s19   ;;  %s6479_s6 = sld [smem:[#allocation45_spill]] }
  0xad   : > { %p638_p4 = scmp.lt.s32.totalorder %s6474_s23, 1  ;;  %s5771_s29 = sshll.u32 %s6429_s13, 1 }
  0xae   : > { %p646_p6 = scmp.lt.s32.totalorder %s6475_s26, 1  ;;  %s637_s21 = scalar_lea.vmem [#allocation14], %s5771_s29 }
  0xaf   : > { %s6509_s23 = smov (!%p638_p4, %s6474_s23), 1  ;;  %p4172_p8 = scmp.ne.s32.totalorder %s6475_s26, 0 }
  0xb0   : > { %s647_s8 = scalar_select %p646_p6, %s6475_s26, 1 }
  0xb1   : > { %s4574_s12 = sshll.u32 %s6509_s23, 4  ;;  %s645_s1 = scalar_lea.vmem %s6476_s10, %s6509_s23 }
  0xb2   : > { %s642_s18 = scalar_lea.vmem %s6477_s22, %s4574_s12  ;;  %s4575_s16 = sshll.u32 %s647_s8, 5 }
  0xb3   : > { %s5789_s19 = scalar_lea.vmem %s6478_s27, %s4575_s16  ;;  %s4171_s13 = sshll.u32 %s647_s8, 3 }
  0xb4   : > { %s5794_s7 = scalar_lea.vmem %s6479_s6, %s4171_s13  ;;  %659 = sbr.rel (%p4172_p8) target bundleno = 187 (0xbb), region = 88 }
  0xb9   : > { %v660_v0 = vld [vmem:[%s642_s18] sm:$0xff]  ;;  %v661_v1 = vld [vmem:[%s642_s18 + $0x8] sm:$0xff] }
  0xba   : > { %662 = vst [vmem:[#allocation2] sm:$0xff] %v660_v0  ;;  %663 = vst [vmem:[#allocation2 + $0x8] sm:$0xff] %v661_v1 }
  0xbb PF: > { %v4743_v2 = vld [vmem:[%s5745_s3 + $0x74] ss:$8 sps:$4 sm:$0xff]   ;;  %v4745_v3 = vld [vmem:[%s5745_s3 + $0x70] ss:$8 sps:$4 sm:$0xff]   ;;  %v4749_v6 = vld [vmem:[%s5745_s3 + $0x64] ss:$8 sps:$4 sm:$0xff]  }
  0xbc   : > { %1115 = vmatprep.subr.bf16.mxu1 %v4743_v2  ;;  %v4746_v4 = vld [vmem:[%s5738_s9 + $0x74] ss:$8 sps:$4 sm:$0xff]   ;;  %v4748_v5 = vld [vmem:[%s5738_s9 + $0x70] ss:$8 sps:$4 sm:$0xff]   ;;  %v4751_v7 = vld [vmem:[%s5745_s3 + $0x60] ss:$8 sps:$4 sm:$0xff]  }
  0xbd   : > { %1116 = vmatpush1.bf16.msra.mxu1 %v4745_v3  ;;  %874 = vmatprep.subr.bf16.mxu0 %v4746_v4  ;;  %v4752_v8 = vld [vmem:[%s5738_s9 + $0x64] ss:$8 sps:$4 sm:$0xff]   ;;  %v4754_v9 = vld [vmem:[%s5738_s9 + $0x60] ss:$8 sps:$4 sm:$0xff]   ;;  %v4755_v10 = vld [vmem:[%s5745_s3 + $0x54] ss:$8 sps:$4 sm:$0xff]  }
  0xbe   : > { %875 = vmatpush1.bf16.msra.mxu0 %v4748_v5  ;;  %1117 = vmatprep.subr.bf16.mxu1 %v4749_v6  ;;  %v4757_v11 = vld [vmem:[%s5745_s3 + $0x50] ss:$8 sps:$4 sm:$0xff]   ;;  %v4758_v12 = vld [vmem:[%s5738_s9 + $0x54] ss:$8 sps:$4 sm:$0xff]   ;;  %v4761_v13 = vld [vmem:[%s5745_s3 + $0x44] ss:$8 sps:$4 sm:$0xff]  }
  0xbf   : > { %876 = vmatprep.subr.bf16.mxu0 %v4752_v8  ;;  %v4760_v14 = vld [vmem:[%s5738_s9 + $0x50] ss:$8 sps:$4 sm:$0xff]   ;;  %v4764_v15 = vld [vmem:[%s5738_s9 + $0x44] ss:$8 sps:$4 sm:$0xff]   ;;  %v4763_v16 = vld [vmem:[%s5745_s3 + $0x40] ss:$8 sps:$4 sm:$0xff]  }
  0xc0   : > { %v4767_v17 = vld [vmem:[%s5745_s3 + $0x34] ss:$8 sps:$4 sm:$0xff]   ;;  %v4766_v18 = vld [vmem:[%s5738_s9 + $0x40] ss:$8 sps:$4 sm:$0xff]   ;;  %v4769_v20 = vld [vmem:[%s5745_s3 + $0x30] ss:$8 sps:$4 sm:$0xff]  }
  0xc1   : > { %1118 = vmatpush1.bf16.msra.mxu1 %v4751_v7  ;;  %v4770_v19 = vld [vmem:[%s5738_s9 + $0x34] ss:$8 sps:$4 sm:$0xff]   ;;  %v4773_v21 = vld [vmem:[%s5745_s3 + $0x24] ss:$8 sps:$4 sm:$0xff]   ;;  %v4772_v22 = vld [vmem:[%s5738_s9 + $0x30] ss:$8 sps:$4 sm:$0xff]  }
  0xc2   : > { %1119 = vmatprep.subr.bf16.mxu1 %v4755_v10  ;;  %877 = vmatpush1.bf16.msra.mxu0 %v4754_v9  ;;  %v4776_v23 = vld [vmem:[%s5738_s9 + $0x24] ss:$8 sps:$4 sm:$0xff]   ;;  %v4775_v24 = vld [vmem:[%s5745_s3 + $0x20] ss:$8 sps:$4 sm:$0xff]   ;;  %v4779_v25 = vld [vmem:[%s5745_s3 + $0x14] ss:$8 sps:$4 sm:$0xff]  }
  0xc3   : > { %878 = vmatprep.subr.bf16.mxu0 %v4758_v12  ;;  %v4778_v26 = vld [vmem:[%s5738_s9 + $0x20] ss:$8 sps:$4 sm:$0xff]   ;;  %v4782_v27 = vld [vmem:[%s5738_s9 + $0x14] ss:$8 sps:$4 sm:$0xff]   ;;  %v4781_v28 = vld [vmem:[%s5745_s3 + $0x10] ss:$8 sps:$4 sm:$0xff]  }
  0xc4   : > { %v4785_v29 = vld [vmem:[%s5745_s3 + $0x4] ss:$8 sps:$4 sm:$0xff]   ;;  %v4784_v30 = vld [vmem:[%s5738_s9 + $0x10] ss:$8 sps:$4 sm:$0xff]   ;;  %v4787_v32 = vld [vmem:[%s5745_s3] ss:$8 sps:$4 sm:$0xff]  }
  0xc5   : > { %1120 = vmatpush1.bf16.msra.mxu1 %v4757_v11  ;;  %v4788_v31 = vld [vmem:[%s5738_s9 + $0x4] ss:$8 sps:$4 sm:$0xff]   ;;  %v4791_v33 = vld [vmem:[%s5745_s3 + $0xf4] ss:$8 sps:$4 sm:$0xff]   ;;  %v4790_v34 = vld [vmem:[%s5738_s9] ss:$8 sps:$4 sm:$0xff]  }
  0xc6   : > { %1121 = vmatprep.subr.bf16.mxu1 %v4761_v13  ;;  %879 = vmatpush1.bf16.msra.mxu0 %v4760_v14  ;;  %v4794_v35 = vld [vmem:[%s5738_s9 + $0xf4] ss:$8 sps:$4 sm:$0xff]   ;;  %v4793_v36 = vld [vmem:[%s5745_s3 + $0xf0] ss:$8 sps:$4 sm:$0xff]   ;;  %v4797_v37 = vld [vmem:[%s5745_s3 + $0xe4] ss:$8 sps:$4 sm:$0xff]  }
  0xc7   : > { %880 = vmatprep.subr.bf16.mxu0 %v4764_v15  ;;  %v4796_v38 = vld [vmem:[%s5738_s9 + $0xf0] ss:$8 sps:$4 sm:$0xff]   ;;  %v4800_v39 = vld [vmem:[%s5738_s9 + $0xe4] ss:$8 sps:$4 sm:$0xff]   ;;  %v4799_v40 = vld [vmem:[%s5745_s3 + $0xe0] ss:$8 sps:$4 sm:$0xff]  }
  0xc8   : > { %v4803_v41 = vld [vmem:[%s5745_s3 + $0xd4] ss:$8 sps:$4 sm:$0xff]   ;;  %v4802_v42 = vld [vmem:[%s5738_s9 + $0xe0] ss:$8 sps:$4 sm:$0xff]   ;;  %v4805_v44 = vld [vmem:[%s5745_s3 + $0xd0] ss:$8 sps:$4 sm:$0xff]  }
  0xc9   : > { %1122 = vmatpush1.bf16.msra.mxu1 %v4763_v16  ;;  %v4806_v43 = vld [vmem:[%s5738_s9 + $0xd4] ss:$8 sps:$4 sm:$0xff]   ;;  %v4809_v45 = vld [vmem:[%s5745_s3 + $0xc4] ss:$8 sps:$4 sm:$0xff]   ;;  %v4808_v46 = vld [vmem:[%s5738_s9 + $0xd0] ss:$8 sps:$4 sm:$0xff]  }
  0xca   : > { %1123 = vmatprep.subr.bf16.mxu1 %v4767_v17  ;;  %881 = vmatpush1.bf16.msra.mxu0 %v4766_v18  ;;  %v4812_v47 = vld [vmem:[%s5738_s9 + $0xc4] ss:$8 sps:$4 sm:$0xff]   ;;  %v5844_v48 = vld [vmem:[#allocation2 + $0x8] sm:$0xff]  ;;  %v4811_v49 = vld [vmem:[%s5745_s3 + $0xc0] ss:$8 sps:$4 sm:$0xff]   ;;  %vm5454_vm0 = vmmov 0  }
  0xcb   : > { %882 = vmatprep.subr.bf16.mxu0 %v4770_v19  ;;  %v673_v50 = vpack.c.bf16 %v5844_v48, %v5844_v48  ;;  %v4815_v51 = vld [vmem:[%s5745_s3 + $0xb4] ss:$8 sps:$4 sm:$0xff]   ;;  %v4814_v52 = vld [vmem:[%s5738_s9 + $0xc0] ss:$8 sps:$4 sm:$0xff]   ;;  %v4817_v54 = vld [vmem:[%s5745_s3 + $0xb0] ss:$8 sps:$4 sm:$0xff]  }
  0xcc   : > { %v4818_v53 = vld [vmem:[%s5738_s9 + $0xb4] ss:$8 sps:$4 sm:$0xff]   ;;  %v4821_v55 = vld [vmem:[%s5745_s3 + $0xa4] ss:$8 sps:$4 sm:$0xff]   ;;  %v4820_v56 = vld [vmem:[%s5738_s9 + $0xb0] ss:$8 sps:$4 sm:$0xff]  }
  0xcd   : > { %1124 = vmatpush1.bf16.msra.mxu1 %v4769_v20  ;;  %1147 = vmatprep.mubr.bf16.mxu1 %v673_v50  ;;  %v4824_v57 = vld [vmem:[%s5738_s9 + $0xa4] ss:$8 sps:$4 sm:$0xff]   ;;  %v4823_v58 = vld [vmem:[%s5745_s3 + $0xa0] ss:$8 sps:$4 sm:$0xff]   ;;  %v4827_v59 = vld [vmem:[%s5745_s3 + $0x94] ss:$8 sps:$4 sm:$0xff]  }
  0xce   : > { %1125 = vmatprep.subr.bf16.mxu1 %v4773_v21  ;;  %883 = vmatpush1.bf16.msra.mxu0 %v4772_v22  ;;  %v4826_v60 = vld [vmem:[%s5738_s9 + $0xa0] ss:$8 sps:$4 sm:$0xff]   ;;  %v4830_v61 = vld [vmem:[%s5738_s9 + $0x94] ss:$8 sps:$4 sm:$0xff]   ;;  %v4829_v62 = vld [vmem:[%s5745_s3 + $0x90] ss:$8 sps:$4 sm:$0xff]  }
  0xcf   : > { %884 = vmatprep.subr.bf16.mxu0 %v4776_v23  ;;  %906 = vmatprep.mubr.bf16.mxu0 %v673_v50  ;;  %v4833_v63 = vld [vmem:[%s5745_s3 + $0x84] ss:$8 sps:$4 sm:$0xff]   ;;  %v4832_v0 = vld [vmem:[%s5738_s9 + $0x90] ss:$8 sps:$4 sm:$0xff]   ;;  %v4835_v1 = vld [vmem:[%s5745_s3 + $0x80] ss:$8 sps:$4 sm:$0xff]  }
  0xd0   : > { %v4836_v2 = vld [vmem:[%s5738_s9 + $0x84] ss:$8 sps:$4 sm:$0xff]   ;;  %v5865_v3 = vld [vmem:[#allocation2] sm:$0xff]  ;;  %v4838_v4 = vld [vmem:[%s5738_s9 + $0x80] ss:$8 sps:$4 sm:$0xff]   ;;  %vm1517_vm1 = vcmask 1043456  }
  0xd1   : > { %1126 = vmatpush1.bf16.msra.mxu1 %v4775_v24  ;;  %v5870_v5 = vpack.c.bf16 %v5865_v3, %v5865_v3  ;;  %v4841_v6 = vld [vmem:[%s5751_s25 + $0x74] ss:$8 sps:$4 sm:$0xff]   ;;  %v4839_v7 = vld [vmem:[%s5751_s25 + $0x70] ss:$8 sps:$4 sm:$0xff]   ;;  %v4844_v8 = vld [vmem:[%s5751_s25 + $0x64] ss:$8 sps:$4 sm:$0xff]  }
  0xd2   : > { %1127 = vmatprep.subr.bf16.mxu1 %v4779_v25  ;;  %885 = vmatpush1.bf16.msra.mxu0 %v4778_v26  ;;  %v4842_v9 = vld [vmem:[%s5751_s25 + $0x60] ss:$8 sps:$4 sm:$0xff]   ;;  %v4847_v10 = vld [vmem:[%s5751_s25 + $0x54] ss:$8 sps:$4 sm:$0xff]   ;;  %v4845_v11 = vld [vmem:[%s5751_s25 + $0x50] ss:$8 sps:$4 sm:$0xff]  }
  0xd3   : > { %886 = vmatprep.subr.bf16.mxu0 %v4782_v27  ;;  %v4850_v12 = vld [vmem:[%s5751_s25 + $0x44] ss:$8 sps:$4 sm:$0xff]   ;;  %v4848_v13 = vld [vmem:[%s5751_s25 + $0x40] ss:$8 sps:$4 sm:$0xff]   ;;  %v4853_v14 = vld [vmem:[%s5751_s25 + $0x34] ss:$8 sps:$4 sm:$0xff]  }
  0xd4   : > { %v4851_v15 = vld [vmem:[%s5751_s25 + $0x30] ss:$8 sps:$4 sm:$0xff]   ;;  %v4856_v16 = vld [vmem:[%s5751_s25 + $0x24] ss:$8 sps:$4 sm:$0xff]   ;;  %v4854_v17 = vld [vmem:[%s5751_s25 + $0x20] ss:$8 sps:$4 sm:$0xff]  }
  0xd5   : > { %1128 = vmatpush1.bf16.msra.mxu1 %v4781_v28  ;;  %v4859_v18 = vld [vmem:[%s5751_s25 + $0x14] ss:$8 sps:$4 sm:$0xff]   ;;  %v4857_v19 = vld [vmem:[%s5751_s25 + $0x10] ss:$8 sps:$4 sm:$0xff]   ;;  %v4862_v20 = vld [vmem:[%s5751_s25 + $0x4] ss:$8 sps:$4 sm:$0xff]  }
  0xd6   : > { %1129 = vmatprep.subr.bf16.mxu1 %v4785_v29  ;;  %887 = vmatpush1.bf16.msra.mxu0 %v4784_v30  ;;  %v4860_v21 = vld [vmem:[%s5751_s25] ss:$8 sps:$4 sm:$0xff]   ;;  %v4865_v22 = vld [vmem:[%s5751_s25 + $0xf4] ss:$8 sps:$4 sm:$0xff]   ;;  %v4863_v23 = vld [vmem:[%s5751_s25 + $0xf0] ss:$8 sps:$4 sm:$0xff]  }
  0xd7   : > { %888 = vmatprep.subr.bf16.mxu0 %v4788_v31  ;;  %v4868_v24 = vld [vmem:[%s5751_s25 + $0xe4] ss:$8 sps:$4 sm:$0xff]   ;;  %v4866_v25 = vld [vmem:[%s5751_s25 + $0xe0] ss:$8 sps:$4 sm:$0xff]   ;;  %v4871_v26 = vld [vmem:[%s5751_s25 + $0xd4] ss:$8 sps:$4 sm:$0xff]  }
  0xd8   : > { %v4869_v27 = vld [vmem:[%s5751_s25 + $0xd0] ss:$8 sps:$4 sm:$0xff]   ;;  %v4874_v28 = vld [vmem:[%s5751_s25 + $0xc4] ss:$8 sps:$4 sm:$0xff]   ;;  %v4872_v29 = vld [vmem:[%s5751_s25 + $0xc0] ss:$8 sps:$4 sm:$0xff]  }
  0xd9   : > { %1130 = vmatpush1.bf16.msra.mxu1 %v4787_v32  ;;  %v4877_v30 = vld [vmem:[%s5751_s25 + $0xb4] ss:$8 sps:$4 sm:$0xff]   ;;  %v4875_v31 = vld [vmem:[%s5751_s25 + $0xb0] ss:$8 sps:$4 sm:$0xff]   ;;  %v4880_v32 = vld [vmem:[%s5751_s25 + $0xa4] ss:$8 sps:$4 sm:$0xff]  }
  0xda   : > { %1131 = vmatprep.subr.bf16.mxu1 %v4791_v33  ;;  %889 = vmatpush1.bf16.msra.mxu0 %v4790_v34  ;;  %v4878_v33 = vld [vmem:[%s5751_s25 + $0xa0] ss:$8 sps:$4 sm:$0xff]   ;;  %v4883_v34 = vld [vmem:[%s5751_s25 + $0x94] ss:$8 sps:$4 sm:$0xff]   ;;  %vm1489_vm2 = vcmask 64512  }
  0xdb   : > { %890 = vmatprep.subr.bf16.mxu0 %v4794_v35  ;;  %v4881_v35 = vld [vmem:[%s5751_s25 + $0x90] ss:$8 sps:$4 sm:$0xff]  }
  0xdd   : > { %1132 = vmatpush2.bf16.msra.mxu1 %v4793_v36  ;;  %v4886_v36 = vld [vmem:[%s5751_s25 + $0x84] ss:$8 sps:$4 sm:$0xff]  }
  0xde   : > { %1133 = vmatprep.subr.bf16.mxu1 %v4797_v37  ;;  %891 = vmatpush2.bf16.msra.mxu0 %v4796_v38  ;;  %v4884_v37 = vld [vmem:[%s5751_s25 + $0x80] ss:$8 sps:$4 sm:$0xff]   ;;  %v5453_v38 = vmov 0.0  }
  0xdf   : > { %892 = vmatprep.subr.bf16.mxu0 %v4800_v39  ;;  %v706_v39 = vlaneseq }
  0xe1   : > { %1134 = vmatpush2.bf16.msra.mxu1 %v4799_v40  ;;  %v5914_v40 = vshrl.u32 %v706_v39, 7 }
  0xe2   : > { %1135 = vmatprep.subr.bf16.mxu1 %v4803_v41  ;;  %893 = vmatpush2.bf16.msra.mxu0 %v4802_v42  ;;  %v5920_v42 = vld [vmem:[%s5789_s19] sm:$0xff] }
  0xe3   : > { %894 = vmatprep.subr.bf16.mxu0 %v4806_v43  ;;  %v5917_v41 = vsub.s32 1, %v5914_v40  ;;  %v5923_v43 = vsub.s32 0, %v5914_v40 }
  0xe5   : > { %1136 = vmatpush2.bf16.msra.mxu1 %v4805_v44  ;;  %v950_v44 = vrot.slane %v5920_v42, %v5917_v41 }
  0xe6   : > { %1137 = vmatprep.subr.bf16.mxu1 %v4809_v45  ;;  %895 = vmatpush2.bf16.msra.mxu0 %v4808_v46  ;;  %v709_v46 = vrot.slane %v5920_v42, %v5923_v43 }
  0xe7   : > { %896 = vmatprep.subr.bf16.mxu0 %v4812_v47  ;;  %v5930_v47 = vld [vmem:[%s5789_s19 + $0x8] sm:$0xff] }
  0xe9   : > { %1138 = vmatpush2.bf16.msra.mxu1 %v4811_v49 }
  0xea   : > { %1139 = vmatprep.subr.bf16.mxu1 %v4815_v51  ;;  %897 = vmatpush2.bf16.msra.mxu0 %v4814_v52 }
  0xeb   : > { %898 = vmatprep.subr.bf16.mxu0 %v4818_v53  ;;  %v954_v53 = vrot.slane %v5930_v47, %v5917_v41 }
  0xed   : > { %1140 = vmatpush2.bf16.msra.mxu1 %v4817_v54 }
  0xee   : > { %1141 = vmatprep.subr.bf16.mxu1 %v4821_v55  ;;  %899 = vmatpush2.bf16.msra.mxu0 %v4820_v56 }
  0xef   : > { %900 = vmatprep.subr.bf16.mxu0 %v4824_v57 }
  0xf1   : > { %1142 = vmatpush2.bf16.msra.mxu1 %v4823_v58 }
  0xf2   : > { %1143 = vmatprep.subr.bf16.mxu1 %v4827_v59  ;;  %901 = vmatpush2.bf16.msra.mxu0 %v4826_v60 }
  0xf3   : > { %902 = vmatprep.subr.bf16.mxu0 %v4830_v61 }
  0xf5   : > { %1144 = vmatpush2.bf16.msra.mxu1 %v4829_v62  ;;  %v713_v62 = vrot.slane %v5930_v47, %v5923_v43 }
  0xf6   : > { %1145 = vmatprep.subr.bf16.mxu1 %v4833_v63  ;;  %903 = vmatpush2.bf16.msra.mxu0 %v4832_v0 }
  0xf7   : > { %904 = vmatprep.subr.bf16.mxu0 %v4836_v2  ;;  %v5940_v2 = vsub.s32 2, %v5914_v40 }
  0xf9   : > { %1146 = vmatpush2.bf16.msra.mxu1 %v4835_v1 }
  0xfa   : > { %905 = vmatpush2.bf16.msra.mxu0 %v4838_v4  ;;  %4597 = vmatprep.subr.bf16.mxu1 %v5453_v38  ;;  %v1191_v4 = vrot.slane %v5920_v42, %v5940_v2 }
  0xfb   : > { %1356 = vmatprep.subr.bf16.mxu0 %v4841_v6 }
  0xfc   : > { %1148 = vmatmul.mubr.bf16.vlgmr.msra.gmra.mxu1 %v5870_v5 }
  0xfd   : > { %907 = vmatmul.mubr.bf16.vlgmr.msra.gmra.mxu0 %v5870_v5  ;;  %4599 = vmatprep.mubr.msk.bf16.mxu1 %vm5454_vm0, %v5453_v38 }
  0xfe   : > { %1357 = vmatpush1.bf16.msra.mxu0 %v4839_v7  ;;  %1388 = vmatprep.mubr.bf16.mxu0 %v673_v50 }
  0xff   : > { %1358 = vmatprep.subr.bf16.mxu0 %v4844_v8 }
 0x102   : > { %1359 = vmatpush1.bf16.msra.mxu0 %v4842_v9 }
 0x103   : > { %1360 = vmatprep.subr.bf16.mxu0 %v4847_v10 }
 0x106   : > { %1361 = vmatpush1.bf16.msra.mxu0 %v4845_v11 }
 0x107   : > { %1362 = vmatprep.subr.bf16.mxu0 %v4850_v12 }
 0x10a   : > { %1363 = vmatpush1.bf16.msra.mxu0 %v4848_v13 }
 0x10b   : > { %1364 = vmatprep.subr.bf16.mxu0 %v4853_v14 }
 0x10e   : > { %1365 = vmatpush1.bf16.msra.mxu0 %v4851_v15 }
 0x10f   : > { %1366 = vmatprep.subr.bf16.mxu0 %v4856_v16  ;;  %v4269_v16 = vld [vmem:[%s645_s1] ss:$0 sm:$0xff] }
 0x112   : > { %1367 = vmatpush1.bf16.msra.mxu0 %v4854_v17 }
 0x113   : > { %1368 = vmatprep.subr.bf16.mxu0 %v4859_v18 }
 0x116   : > { %1369 = vmatpush1.bf16.msra.mxu0 %v4857_v19 }
 0x117   : > { %1370 = vmatprep.subr.bf16.mxu0 %v4862_v20 }
 0x11a   : > { %1371 = vmatpush1.bf16.msra.mxu0 %v4860_v21 }
 0x11b   : > { %1372 = vmatprep.subr.bf16.mxu0 %v4865_v22 }
 0x11e   : > { %1373 = vmatpush2.bf16.msra.mxu0 %v4863_v23 }
 0x11f   : > { %1374 = vmatprep.subr.bf16.mxu0 %v4868_v24 }
 0x122   : > { %1375 = vmatpush2.bf16.msra.mxu0 %v4866_v25 }
 0x123   : > { %1376 = vmatprep.subr.bf16.mxu0 %v4871_v26 }
 0x126   : > { %1377 = vmatpush2.bf16.msra.mxu0 %v4869_v27 }
 0x127   : > { %1378 = vmatprep.subr.bf16.mxu0 %v4874_v28 }
 0x12a   : > { %1379 = vmatpush2.bf16.msra.mxu0 %v4872_v29 }
 0x12b   : > { %1380 = vmatprep.subr.bf16.mxu0 %v4877_v30 }
 0x12e   : > { %1381 = vmatpush2.bf16.msra.mxu0 %v4875_v31 }
 0x12f   : > { %1382 = vmatprep.subr.bf16.mxu0 %v4880_v32 }
 0x132   : > { %1383 = vmatpush2.bf16.msra.mxu0 %v4878_v33 }
 0x133   : > { %1384 = vmatprep.subr.bf16.mxu0 %v4883_v34 }
 0x136   : > { %1385 = vmatpush2.bf16.msra.mxu0 %v4881_v35 }
 0x137   : > { %1386 = vmatprep.subr.bf16.mxu0 %v4886_v36 }
 0x13a   : > { %1387 = vmatpush2.bf16.msra.mxu0 %v4884_v37 }
 0x13b   : > { %4585 = vmatprep.subr.bf16.mxu0 %v5453_v38 }
 0x13d   : > { %1389 = vmatmul.mubr.bf16.vlgmr.msra.gmra.mxu0 %v5870_v5  ;;  %v1195_v5 = vrot.slane %v5930_v47, %v5940_v2 }
 0x13e   : > { %4587 = vmatprep.mubr.msk.bf16.mxu0 %vm5454_vm0, %v5453_v38 }
 0x1bc   : > { %v1149_v45 = vpop.f32.mrf.mxu1 }
 0x1bd   : > { %v1150_v49 = vadd.f32 %v1149_v45, %v950_v44  ;;  %v908_v50 = vpop.f32.mrf.mxu0 }
 0x1be   : > { %v1151_v51 = vpop.f32.mrf.mxu1  ;;  %v909_v54 = vadd.f32 %v908_v50, %v709_v46 }
 0x1bf   : > { %v1399_v52 = vpack.c.bf16 %v1150_v49, %v1150_v49  ;;  %v910_v55 = vpop.f32.mrf.mxu0  ;;  %v1152_v59 = vadd.f32 %v1151_v51, %v954_v53 }
 0x1c0   : > { %v1153_v56 = vpop.f32.mrf.mxu1  ;;  %v1397_v60 = vpack.c.bf16 %v909_v54, %v909_v54  ;;  %v911_v0 = vadd.f32 %v910_v55, %v713_v62  ;;  %v4887_v55 = vld [vmem:[%s5753_s11 + $0x70] ss:$8 sps:$4 sm:$0xff]   ;;  %v4901_v62 = vld [vmem:[%s5753_s11 + $0x34] ss:$8 sps:$4 sm:$0xff]  }
 0x1c1   : > { %4586 = vmatpush3.bf16.xpose.msra.mxu0 %v1399_v52  ;;  %v912_v57 = vpop.f32.mrf.mxu0  ;;  %v1400_v63 = vpack.c.bf16 %v1152_v59, %v1152_v59  ;;  %v4889_v52 = vld [vmem:[%s5753_s11 + $0x74] ss:$8 sps:$4 sm:$0xff]  }
 0x1c2   : > { %v1154_v58 = vpop.f32.mrf.mxu1  ;;  %4591 = vmatprep.subr.bf16.mxu0 %v5453_v38  ;;  %v1398_v1 = vpack.c.bf16 %v911_v0, %v911_v0  ;;  %v4892_v57 = vld [vmem:[%s5753_s11 + $0x64] ss:$8 sps:$4 sm:$0xff]   ;;  %v4895_v59 = vld [vmem:[%s5753_s11 + $0x54] ss:$8 sps:$4 sm:$0xff]  }
 0x1c3   : > { %v913_v61 = vpop.f32.mrf.mxu0  ;;  %v4890_v58 = vld [vmem:[%s5753_s11 + $0x60] ss:$8 sps:$4 sm:$0xff]   ;;  %v4904_v0 = vld [vmem:[%s5753_s11 + $0x24] ss:$8 sps:$4 sm:$0xff]  }
 0x1c4   : > { %v4896_v61 = vld [vmem:[%s5753_s11 + $0x40] ss:$8 sps:$4 sm:$0xff]  }
 0x1c8   : > { %4588 = vmatmul.mubr.bf16.vlgmr.msra.gmra.mxu0 %v1397_v60  ;;  %v4898_v60 = vld [vmem:[%s5753_s11 + $0x44] ss:$8 sps:$4 sm:$0xff]  }
 0x1c9   : > { %4592 = vmatpush3.bf16.xpose.msra.mxu0 %v1400_v63  ;;  %4593 = vmatprep.mubr.msk.bf16.mxu0 %vm5454_vm0, %v5453_v38  ;;  %v4899_v63 = vld [vmem:[%s5753_s11 + $0x30] ss:$8 sps:$4 sm:$0xff]  }
 0x1d0   : > { %4594 = vmatmul.mubr.bf16.vlgmr.msra.gmra.mxu0 %v1398_v1  ;;  %v4902_v1 = vld [vmem:[%s5753_s11 + $0x20] ss:$8 sps:$4 sm:$0xff]  }
 0x1fd   : > { %v1390_v6 = vpop.f32.mrf.mxu0 }
 0x1fe   : > { %v1391_v7 = vadd.f32 %v1390_v6, %v1191_v4  ;;  %v4907_v4 = vld [vmem:[%s5753_s11 + $0x14] ss:$8 sps:$4 sm:$0xff]   ;;  %v4910_v6 = vld [vmem:[%s5753_s11 + $0x4] ss:$8 sps:$4 sm:$0xff]  }
 0x1ff   : > { %v1392_v8 = vpop.f32.mrf.mxu0 }
 0x200   : > { %v1401_v9 = vpack.c.bf16 %v1391_v7, %v1391_v7  ;;  %v1393_v10 = vadd.f32 %v1392_v8, %v1195_v5  ;;  %v4905_v5 = vld [vmem:[%s5753_s11 + $0x10] ss:$8 sps:$4 sm:$0xff]   ;;  %v4908_v7 = vld [vmem:[%s5753_s11] ss:$8 sps:$4 sm:$0xff]   ;;  %v4913_v8 = vld [vmem:[%s5753_s11 + $0xf4] ss:$8 sps:$4 sm:$0xff]  }
 0x201   : > { %v1394_v11 = vpop.f32.mrf.mxu0 }
 0x202   : > { %v1519_v12 = vsel %vm1517_vm1, %v1401_v9, 0  ;;  %v1402_v13 = vpack.c.bf16 %v1393_v10, %v1393_v10  ;;  %v4911_v9 = vld [vmem:[%s5753_s11 + $0xf0] ss:$8 sps:$4 sm:$0xff]   ;;  %v4916_v10 = vld [vmem:[%s5753_s11 + $0xe4] ss:$8 sps:$4 sm:$0xff]  }
 0x203   : > { %v1395_v14 = vpop.f32.mrf.mxu0  ;;  %4598 = vmatpush3.bf16.msra.mxu1 %v1519_v12  ;;  %v4914_v11 = vld [vmem:[%s5753_s11 + $0xe0] ss:$8 sps:$4 sm:$0xff]   ;;  %v4919_v12 = vld [vmem:[%s5753_s11 + $0xd4] ss:$8 sps:$4 sm:$0xff]  }
 0x204   : > { %v1565_v15 = vsel %vm1517_vm1, %v1402_v13, 0  ;;  %4603 = vmatprep.subr.bf16.mxu1 %v5453_v38  ;;  %v4917_v13 = vld [vmem:[%s5753_s11 + $0xd0] ss:$8 sps:$4 sm:$0xff]   ;;  %v4922_v14 = vld [vmem:[%s5753_s11 + $0xc4] ss:$8 sps:$4 sm:$0xff]  }
 0x288   : > { %v1443_v17 = vpop.f32.mrf.mxu0 }
 0x289   : > { %v1444_v18 = vadd.f32 %v4269_v16, %v1443_v17  ;;  %v4923_v17 = vld [vmem:[%s5753_s11 + $0xb0] ss:$8 sps:$4 sm:$0xff]  }
 0x28a   : > { %v4589_v19 = vpop.f32.mrf.mxu0 }
 0x28b   : > { %v1490_v20 = vsel %vm1489_vm2, %v1444_v18, -inf  ;;  %v4926_v19 = vld [vmem:[%s5753_s11 + $0xa0] ss:$8 sps:$4 sm:$0xff]  }
 0x28c   : > { %1491 = vmax.xlane.f32.xlu0 %v1490_v20  ;;  %v1446_v21 = vpop.f32.mrf.mxu0  ;;  %v4931_v20 = vld [vmem:[%s5753_s11 + $0x94] ss:$8 sps:$4 sm:$0xff]  }
 0x28d   : > { %v4929_v21 = vld [vmem:[%s5753_s11 + $0x90] ss:$8 sps:$4 sm:$0xff]  }
 0x28e   : > { %v4590_v22 = vpop.f32.mrf.mxu0 }
 0x28f   : > { %v4934_v22 = vld [vmem:[%s5753_s11 + $0x84] ss:$8 sps:$4 sm:$0xff]  }
 0x290   : > { %v1483_v23 = vpop.f32.mrf.mxu0 }
 0x291   : > { %v1484_v24 = vadd.f32 %v4269_v16, %v1483_v23  ;;  %v4925_v16 = vld [vmem:[%s5753_s11 + $0xb4] ss:$8 sps:$4 sm:$0xff]   ;;  %v4932_v23 = vld [vmem:[%s5753_s11 + $0x80] ss:$8 sps:$4 sm:$0xff]  }
 0x292   : > { %v4595_v25 = vpop.f32.mrf.mxu0 }
 0x293   : > { %v1493_v26 = vsel %vm1489_vm2, %v1484_v24, -inf }
 0x294   : > { %1494 = vmax.xlane.f32.xlu0 %v1493_v26  ;;  %v1486_v27 = vpop.f32.mrf.mxu0 }
 0x296   : > { %v4596_v28 = vpop.f32.mrf.mxu0 }
 0x315   : > { %v1492_v29 = vpop.xlane.xlu0 %1491 }
 0x316   : > { %v1496_v30 = vsub.f32 %v1444_v18, %v1492_v29  ;;  %v4928_v18 = vld [vmem:[%s5753_s11 + $0xa4] ss:$8 sps:$4 sm:$0xff]  }
 0x318   : > { %v1498_v31 = vmul.f32 1.442695, %v1496_v30 }
 0x31a   : > { %5127 = vpow2.f32 %v1498_v31 }
 0x31d   : > { %v1495_v32 = vpop.xlane.xlu0 %1494 }
 0x31e   : > { %v1497_v33 = vsub.f32 %v1484_v24, %v1495_v32 }
 0x320   : > { %v1500_v34 = vmul.f32 1.442695, %v1497_v33 }
 0x322   : > { %5129 = vpow2.f32 %v1500_v34  ;;  %v5993_v34 = vsub.s32 3, %v5914_v40 }
 0x327   : > { %v5128_v35 = vpop.eup %5127 }
 0x328   : > { %v1502_v36 = vsel %vm1489_vm2, %v5128_v35, 0.0 }
 0x329   : > { %1503 = vadd.xlane.f32.xlu1 %v1502_v36  ;;  %v1648_v36 = vrot.slane %v5930_v47, %v5993_v34 }
 0x32f   : > { %v5130_v37 = vpop.eup %5129 }
 0x330   : > { %v1505_v44 = vsel %vm1489_vm2, %v5130_v37, 0.0 }
 0x331   : > { %1506 = vadd.xlane.f32.xlu1 %v1505_v44 }
 0x3b2   : > { %v1504_v45 = vpop.xlane.xlu1 %1503 }
 0x3b3   : > { %5131 = vrcp.f32 %v1504_v45 }
 0x3ba   : > { %v1507_v46 = vpop.xlane.xlu1 %1506 }
 0x3bb   : > { %5133 = vrcp.f32 %v1507_v46 }
 0x3c0   : > { %v5132_v49 = vpop.eup %5131 }
 0x3c1   : > { %v1510_v50 = vmul.f32 %v5132_v49, %v5128_v35  ;;  %v1644_v35 = vrot.slane %v5920_v42, %v5993_v34 }
 0x3c3   : > { %v1512_v51 = vpack.c.bf16 %v1510_v50, %v1510_v50 }
 0x3c5   : > { %4600 = vmatmul.mubr.msk.bf16.vlgmr.msra.gmra.mxu1 %vm1489_vm2, %v1512_v51 }
 0x3c6   : > { %4604 = vmatpush3.bf16.msra.mxu1 %v1565_v15  ;;  %4605 = vmatprep.mubr.msk.bf16.mxu1 %vm5454_vm0, %v5453_v38  ;;  %v4893_v38 = vld [vmem:[%s5753_s11 + $0x50] ss:$8 sps:$4 sm:$0xff]   ;;  %v4920_v15 = vld [vmem:[%s5753_s11 + $0xc0] ss:$8 sps:$4 sm:$0xff]  }
 0x3c7   : > { %1809 = vmatprep.subr.bf16.mxu1 %v4889_v52 }
 0x3c8   : > { %v5134_v53 = vpop.eup %5133 }
 0x3c9   : > { %v1511_v54 = vmul.f32 %v5134_v53, %v5130_v37 }
 0x3cb   : > { %v1513_v56 = vpack.c.bf16 %v1511_v54, %v1511_v54  ;;  %v1947_v54 = vld [vmem:[%s5759_s5 + $0x1c0] sm:$0xff] }
 0x3cd   : > { %4606 = vmatmul.mubr.msk.bf16.vlgmr.msra.gmra.mxu1 %vm1489_vm2, %v1513_v56  ;;  %v1948_v56 = vld [vmem:[%s5759_s5 + $0x1c8] sm:$0xff] }
 0x3ce   : > { %1810 = vmatpush1.bf16.msra.mxu1 %v4887_v55  ;;  %v1951_v55 = vld [vmem:[%s5759_s5 + $0x1e0] sm:$0xff] }
 0x3cf   : > { %1811 = vmatprep.subr.bf16.mxu1 %v4892_v57  ;;  %v4360_v57 = vcombine.low %v1947_v54, %v1951_v55 }
 0x3d2   : > { %1812 = vmatpush1.bf16.msra.mxu1 %v4890_v58  ;;  %v1952_v58 = vld [vmem:[%s5759_s5 + $0x1e8] sm:$0xff] }
 0x3d3   : > { %1813 = vmatprep.subr.bf16.mxu1 %v4895_v59  ;;  %v1939_v59 = vld [vmem:[%s5759_s5 + $0x180] sm:$0xff] }
 0x3d6   : > { %1814 = vmatpush1.bf16.msra.mxu1 %v4893_v38  ;;  %v1943_v38 = vld [vmem:[%s5759_s5 + $0x1a0] sm:$0xff] }
 0x3d7   : > { %1815 = vmatprep.subr.bf16.mxu1 %v4898_v60  ;;  %v4363_v60 = vcombine.high %v1948_v56, %v1952_v58 }
 0x3da   : > { %1816 = vmatpush1.bf16.msra.mxu1 %v4896_v61  ;;  %v4353_v61 = vcombine.high %v1939_v59, %v1943_v38 }
 0x3db   : > { %1817 = vmatprep.subr.bf16.mxu1 %v4901_v62  ;;  %v1940_v62 = vld [vmem:[%s5759_s5 + $0x188] sm:$0xff] }
 0x3de   : > { %1818 = vmatpush1.bf16.msra.mxu1 %v4899_v63  ;;  %v1944_v63 = vld [vmem:[%s5759_s5 + $0x1a8] sm:$0xff] }
 0x3df   : > { %1819 = vmatprep.subr.bf16.mxu1 %v4904_v0  ;;  %v1931_v0 = vld [vmem:[%s5759_s5 + $0x140] sm:$0xff] }
 0x3e2   : > { %1820 = vmatpush1.bf16.msra.mxu1 %v4902_v1  ;;  %v4355_v1 = vcombine.high %v1940_v62, %v1944_v63 }
 0x3e3   : > { %1821 = vmatprep.subr.bf16.mxu1 %v4907_v4  ;;  %v1935_v4 = vld [vmem:[%s5759_s5 + $0x160] sm:$0xff] }
 0x3e6   : > { %1822 = vmatpush1.bf16.msra.mxu1 %v4905_v5  ;;  %v1932_v5 = vld [vmem:[%s5759_s5 + $0x148] sm:$0xff] }
 0x3e7   : > { %1823 = vmatprep.subr.bf16.mxu1 %v4910_v6  ;;  %v1936_v6 = vld [vmem:[%s5759_s5 + $0x168] sm:$0xff] }
 0x3ea   : > { %1824 = vmatpush1.bf16.msra.mxu1 %v4908_v7  ;;  %v4352_v7 = vcombine.low %v1939_v59, %v1943_v38 }
 0x3eb   : > { %1825 = vmatprep.subr.bf16.mxu1 %v4913_v8  ;;  %v4354_v8 = vcombine.low %v1940_v62, %v1944_v63  ;;  %v2016_v62 = vld [vmem:[%s5759_s5 + $0x3e8] sm:$0xff] }
 0x3ee   : > { %1826 = vmatpush2.bf16.msra.mxu1 %v4911_v9  ;;  %v4345_v9 = vcombine.high %v1931_v0, %v1935_v4 }
 0x3ef   : > { %1827 = vmatprep.subr.bf16.mxu1 %v4916_v10  ;;  %v4347_v10 = vcombine.high %v1932_v5, %v1936_v6 }
 0x3f2   : > { %1828 = vmatpush2.bf16.msra.mxu1 %v4914_v11  ;;  %v1923_v11 = vld [vmem:[%s5759_s5 + $0x100] sm:$0xff] }
 0x3f3   : > { %1829 = vmatprep.subr.bf16.mxu1 %v4919_v12  ;;  %v1927_v12 = vld [vmem:[%s5759_s5 + $0x120] sm:$0xff] }
 0x3f6   : > { %1830 = vmatpush2.bf16.msra.mxu1 %v4917_v13  ;;  %v1924_v13 = vld [vmem:[%s5759_s5 + $0x108] sm:$0xff] }
 0x3f7   : > { %1831 = vmatprep.subr.bf16.mxu1 %v4922_v14  ;;  %v1928_v14 = vld [vmem:[%s5759_s5 + $0x128] sm:$0xff] }
 0x3fa   : > { %1832 = vmatpush2.bf16.msra.mxu1 %v4920_v15  ;;  %v4344_v15 = vcombine.low %v1931_v0, %v1935_v4 }
 0x3fb   : > { %1833 = vmatprep.subr.bf16.mxu1 %v4925_v16  ;;  %v4346_v16 = vcombine.low %v1932_v5, %v1936_v6  ;;  %v2003_v5 = vld [vmem:[%s5759_s5 + $0x380] sm:$0xff] }
 0x3fc   : > { %v2007_v6 = vld [vmem:[%s5759_s5 + $0x3a0] sm:$0xff] }
 0x3fe   : > { %1834 = vmatpush2.bf16.msra.mxu1 %v4923_v17  ;;  %v4337_v17 = vcombine.high %v1923_v11, %v1927_v12 }
 0x3ff   : > { %1835 = vmatprep.subr.bf16.mxu1 %v4928_v18  ;;  %v4339_v18 = vcombine.high %v1924_v13, %v1928_v14 }
 0x402   : > { %1836 = vmatpush2.bf16.msra.mxu1 %v4926_v19  ;;  %v1915_v19 = vld [vmem:[%s5759_s5 + $0xc0] sm:$0xff] }
 0x403   : > { %1837 = vmatprep.subr.bf16.mxu1 %v4931_v20  ;;  %v1919_v20 = vld [vmem:[%s5759_s5 + $0xe0] sm:$0xff] }
 0x406   : > { %1838 = vmatpush2.bf16.msra.mxu1 %v4929_v21  ;;  %v1916_v21 = vld [vmem:[%s5759_s5 + $0xc8] sm:$0xff] }
 0x407   : > { %1839 = vmatprep.subr.bf16.mxu1 %v4934_v22  ;;  %v1920_v22 = vld [vmem:[%s5759_s5 + $0xe8] sm:$0xff] }
 0x40a   : > { %1840 = vmatpush2.bf16.msra.mxu1 %v4932_v23  ;;  %v4336_v23 = vcombine.low %v1923_v11, %v1927_v12  ;;  %v4417_v11 = vcombine.high %v2003_v5, %v2007_v6 }
 0x40b   : > { %2741 = vmatprep.subr.bf16.mxu1 %v4363_v60  ;;  %v2015_v60 = vld [vmem:[%s5759_s5 + $0x3e0] sm:$0xff] }
 0x485   : > { %v1555_v24 = vpop.f32.mrf.mxu1 }
 0x486   : > { %v1607_v30 = vpack.c.bf16 %v1555_v24, %v1555_v24  ;;  %v4338_v24 = vcombine.low %v1924_v13, %v1928_v14  ;;  %v4416_v13 = vcombine.low %v2003_v5, %v2007_v6  ;;  %v1959_v5 = vld [vmem:[%s5759_s5 + $0x220] sm:$0xff]  ;;  %v1956_v6 = vld [vmem:[%s5759_s5 + $0x208] sm:$0xff] }
 0x487   : > { %v4601_v25 = vpop.f32.mrf.mxu1 }
 0x488   : > { %v4329_v25 = vcombine.high %v1915_v19, %v1919_v20 }
 0x489   : > { %v1558_v26 = vpop.f32.mrf.mxu1 }
 0x48a   : > { %v4331_v26 = vcombine.high %v1916_v21, %v1920_v22 }
 0x48b   : > { %v4602_v27 = vpop.f32.mrf.mxu1 }
 0x48c   : > { %v1907_v27 = vld [vmem:[%s5759_s5 + $0x80] sm:$0xff] }
 0x48d   : > { %v1601_v28 = vpop.f32.mrf.mxu1 }
 0x48e   : > { %v1608_v29 = vpack.c.bf16 %v1601_v28, %v1601_v28  ;;  %v1911_v28 = vld [vmem:[%s5759_s5 + $0xa0] sm:$0xff] }
 0x48f   : > { %v4607_v31 = vpop.f32.mrf.mxu1 }
 0x490   : > { %1841 = vmatprep.mubr.bf16.mxu1 %v1608_v29  ;;  %v1908_v29 = vld [vmem:[%s5759_s5 + $0x88] sm:$0xff]  ;;  %v4328_v31 = vcombine.low %v1915_v19, %v1919_v20 }
 0x491   : > { %v1604_v32 = vpop.f32.mrf.mxu1  ;;  %1842 = vmatmul.mubr.bf16.vlgmr.msra.gmra.mxu1 %v1607_v30  ;;  %v1912_v30 = vld [vmem:[%s5759_s5 + $0xa8] sm:$0xff] }
 0x492   : > { %v4330_v32 = vcombine.low %v1916_v21, %v1920_v22  ;;  %v1995_v22 = vld [vmem:[%s5759_s5 + $0x340] sm:$0xff] }
 0x493   : > { %v4608_v33 = vpop.f32.mrf.mxu1 }
 0x494   : > { %v4321_v33 = vcombine.high %v1907_v27, %v1911_v28 }
 0x551   : > { %v1843_v37 = vpop.f32.mrf.mxu1 }
 0x552   : > { %v1844_v44 = vadd.f32 %v1843_v37, %v1644_v35  ;;  %v4323_v35 = vcombine.high %v1908_v29, %v1912_v30  ;;  %v1903_v37 = vld [vmem:[%s5759_s5 + $0x60] sm:$0xff] }
 0x553   : > { %v1845_v45 = vpop.f32.mrf.mxu1 }
 0x554   : > { %v1846_v46 = vadd.f32 %v1845_v45, %v1648_v36  ;;  %v6000_v50 = vadd.f32 %v1844_v44, %v5865_v3  ;;  %v4361_v3 = vcombine.high %v1947_v54, %v1951_v55  ;;  %v1899_v36 = vld [vmem:[%s5759_s5 + $0x40] sm:$0xff]  ;;  %v1900_v44 = vld [vmem:[%s5759_s5 + $0x48] sm:$0xff] }
 0x555   : > { %v1847_v49 = vpop.f32.mrf.mxu1  ;;  %v1904_v45 = vld [vmem:[%s5759_s5 + $0x68] sm:$0xff]  ;;  %v1891_v54 = vld [vmem:[%s5759_s5] sm:$0xff] }
 0x556   : > { %v6003_v51 = vadd.f32 %v1846_v46, %v5844_v48  ;;  %v4362_v48 = vcombine.low %v1948_v56, %v1952_v58  ;;  %2700 = vmatprep.subr.bf16.mxu0 %v4361_v3  ;;  %v4320_v46 = vcombine.low %v1907_v27, %v1911_v28  ;;  %v4322_v49 = vcombine.low %v1908_v29, %v1912_v30  ;;  %v1895_v55 = vld [vmem:[%s5759_s5 + $0x20] sm:$0xff]  ;;  %v1892_v56 = vld [vmem:[%s5759_s5 + $0x8] sm:$0xff] }
 0x557   : > { %v1848_v52 = vpop.f32.mrf.mxu1  ;;  %2701 = vmatpush1.bf16.msra.mxu0 %v4360_v57  ;;  %v1896_v57 = vld [vmem:[%s5759_s5 + $0x28] sm:$0xff]  ;;  %v4312_v3 = vcombine.low %v1899_v36, %v1903_v37  ;;  %v4314_v58 = vcombine.low %v1900_v44, %v1904_v45  ;;  %v4305_v59 = vcombine.high %v1891_v54, %v1895_v55  ;;  %v4304_v63 = vcombine.low %v1891_v54, %v1895_v55  ;;  %v1987_v28 = vld [vmem:[%s5759_s5 + $0x300] sm:$0xff] }
 0x558   : > { %v1852_v53 = vadd.f32 %v6003_v51, %v6000_v50  ;;  %2742 = vmatpush1.bf16.msra.mxu1 %v4362_v48  ;;  %2702 = vmatprep.subr.bf16.mxu0 %v4353_v61  ;;  %v4313_v52 = vcombine.high %v1899_v36, %v1903_v37  ;;  %v4307_v38 = vcombine.high %v1892_v56, %v1896_v57  ;;  %v2011_v48 = vld [vmem:[%s5759_s5 + $0x3c0] sm:$0xff]  ;;  %v2012_v61 = vld [vmem:[%s5759_s5 + $0x3c8] sm:$0xff] }
 0x559   : > { %2743 = vmatprep.subr.bf16.mxu1 %v4355_v1  ;;  %v4306_v0 = vcombine.low %v1892_v56, %v1896_v57  ;;  %v4425_v1 = vcombine.high %v2011_v48, %v2015_v60  ;;  %v4427_v4 = vcombine.high %v2012_v61, %v2016_v62  ;;  %v1991_v29 = vld [vmem:[%s5759_s5 + $0x320] sm:$0xff]  ;;  %v1988_v30 = vld [vmem:[%s5759_s5 + $0x308] sm:$0xff] }
 0x55a   : > { %1853 = vadd.xlane.f32.xlu0 %v1852_v53  ;;  %v4315_v53 = vcombine.high %v1900_v44, %v1904_v45  ;;  %v1983_v36 = vld [vmem:[%s5759_s5 + $0x2e0] sm:$0xff]  ;;  %v1972_v55 = vld [vmem:[%s5759_s5 + $0x288] sm:$0xff] }
 0x55b   : > { %2703 = vmatpush1.bf16.msra.mxu0 %v4352_v7  ;;  %v2004_v7 = vld [vmem:[%s5759_s5 + $0x388] sm:$0xff]  ;;  %v1975_v54 = vld [vmem:[%s5759_s5 + $0x2a0] sm:$0xff] }
 0x55c   : > { %2744 = vmatpush1.bf16.msra.mxu1 %v4354_v8  ;;  %2704 = vmatprep.subr.bf16.mxu0 %v4345_v9  ;;  %v2008_v8 = vld [vmem:[%s5759_s5 + $0x3a8] sm:$0xff]  ;;  %v4424_v9 = vcombine.low %v2011_v48, %v2015_v60  ;;  %v1967_v48 = vld [vmem:[%s5759_s5 + $0x260] sm:$0xff] }
 0x55d   : > { %2745 = vmatprep.subr.bf16.mxu1 %v4347_v10  ;;  %v4426_v10 = vcombine.low %v2012_v61, %v2016_v62  ;;  %v4419_v12 = vcombine.high %v2004_v7, %v2008_v8  ;;  %v4418_v14 = vcombine.low %v2004_v7, %v2008_v8  ;;  %v1976_v56 = vld [vmem:[%s5759_s5 + $0x2a8] sm:$0xff] }
 0x55e   : > { %v1964_v60 = vld [vmem:[%s5759_s5 + $0x248] sm:$0xff] }
 0x55f   : > { %2705 = vmatpush1.bf16.msra.mxu0 %v4344_v15  ;;  %v1968_v61 = vld [vmem:[%s5759_s5 + $0x268] sm:$0xff] }
 0x560   : > { %2746 = vmatpush1.bf16.msra.mxu1 %v4346_v16  ;;  %2706 = vmatprep.subr.bf16.mxu0 %v4337_v17  ;;  %v1960_v7 = vld [vmem:[%s5759_s5 + $0x228] sm:$0xff] }
 0x561   : > { %2747 = vmatprep.subr.bf16.mxu1 %v4339_v18 }
 0x563   : > { %2707 = vmatpush1.bf16.msra.mxu0 %v4336_v23  ;;  %v1999_v23 = vld [vmem:[%s5759_s5 + $0x360] sm:$0xff] }
 0x564   : > { %2748 = vmatpush1.bf16.msra.mxu1 %v4338_v24  ;;  %2708 = vmatprep.subr.bf16.mxu0 %v4329_v25  ;;  %v1996_v24 = vld [vmem:[%s5759_s5 + $0x348] sm:$0xff]  ;;  %v4408_v25 = vcombine.low %v1995_v22, %v1999_v23 }
 0x565   : > { %2749 = vmatprep.subr.bf16.mxu1 %v4331_v26 }
 0x567   : > { %2709 = vmatpush1.bf16.msra.mxu0 %v4328_v31  ;;  %v4400_v31 = vcombine.low %v1987_v28, %v1991_v29 }
 0x568   : > { %2750 = vmatpush1.bf16.msra.mxu1 %v4330_v32  ;;  %2710 = vmatprep.subr.bf16.mxu0 %v4321_v33  ;;  %v4401_v32 = vcombine.high %v1987_v28, %v1991_v29  ;;  %v1992_v33 = vld [vmem:[%s5759_s5 + $0x328] sm:$0xff] }
 0x569   : > { %2751 = vmatprep.subr.bf16.mxu1 %v4323_v35  ;;  %v1979_v35 = vld [vmem:[%s5759_s5 + $0x2c0] sm:$0xff]  ;;  %v4402_v37 = vcombine.low %v1988_v30, %v1992_v33  ;;  %v4403_v44 = vcombine.high %v1988_v30, %v1992_v33 }
 0x56a   : > { %v4393_v45 = vcombine.high %v1979_v35, %v1983_v36  ;;  %v4392_v57 = vcombine.low %v1979_v35, %v1983_v36 }
 0x56b   : > { %2711 = vmatpush1.bf16.msra.mxu0 %v4320_v46  ;;  %v1980_v46 = vld [vmem:[%s5759_s5 + $0x2c8] sm:$0xff] }
 0x56c   : > { %2752 = vmatpush1.bf16.msra.mxu1 %v4322_v49  ;;  %2712 = vmatprep.subr.bf16.mxu0 %v4313_v52  ;;  %v1984_v49 = vld [vmem:[%s5759_s5 + $0x2e8] sm:$0xff]  ;;  %v1971_v52 = vld [vmem:[%s5759_s5 + $0x280] sm:$0xff] }
 0x56d   : > { %2753 = vmatprep.subr.bf16.mxu1 %v4315_v53  ;;  %v4395_v53 = vcombine.high %v1980_v46, %v1984_v49  ;;  %v4384_v62 = vcombine.low %v1971_v52, %v1975_v54 }
 0x56f   : > { %2713 = vmatpush1.bf16.msra.mxu0 %v4312_v3  ;;  %v4394_v3 = vcombine.low %v1980_v46, %v1984_v49  ;;  %v1945_v46 = vld [vmem:[%s5759_s5 + $0x1b0] sm:$0xff]  ;;  %v1946_v49 = vld [vmem:[%s5759_s5 + $0x1b8] sm:$0xff] }
 0x570   : > { %2754 = vmatpush1.bf16.msra.mxu1 %v4314_v58  ;;  %2714 = vmatprep.subr.bf16.mxu0 %v4305_v59  ;;  %v4385_v58 = vcombine.high %v1971_v52, %v1975_v54  ;;  %v4387_v59 = vcombine.high %v1972_v55, %v1976_v56  ;;  %v1937_v54 = vld [vmem:[%s5759_s5 + $0x170] sm:$0xff] }
 0x571   : > { %2755 = vmatprep.subr.bf16.mxu1 %v4307_v38  ;;  %v1963_v38 = vld [vmem:[%s5759_s5 + $0x240] sm:$0xff] }
 0x572   : > { %v4376_v8 = vcombine.low %v1963_v38, %v1967_v48 }
 0x573   : > { %2715 = vmatpush1.bf16.msra.mxu0 %v4304_v63  ;;  %v4386_v63 = vcombine.low %v1972_v55, %v1976_v56  ;;  %v1934_v55 = vld [vmem:[%s5759_s5 + $0x158] sm:$0xff] }
 0x574   : > { %2756 = vmatpush1.bf16.msra.mxu1 %v4306_v0  ;;  %2716 = vmatprep.subr.bf16.mxu0 %v4425_v1  ;;  %v4377_v0 = vcombine.high %v1963_v38, %v1967_v48  ;;  %v4379_v1 = vcombine.high %v1964_v60, %v1968_v61  ;;  %v1938_v56 = vld [vmem:[%s5759_s5 + $0x178] sm:$0xff]  ;;  %v1925_v38 = vld [vmem:[%s5759_s5 + $0x110] sm:$0xff] }
 0x575   : > { %2757 = vmatprep.subr.bf16.mxu1 %v4427_v4  ;;  %v1955_v4 = vld [vmem:[%s5759_s5 + $0x200] sm:$0xff]  ;;  %v1929_v48 = vld [vmem:[%s5759_s5 + $0x130] sm:$0xff] }
 0x577   : > { %2717 = vmatpush2.bf16.msra.mxu0 %v4424_v9  ;;  %v4378_v9 = vcombine.low %v1964_v60, %v1968_v61  ;;  %v1926_v60 = vld [vmem:[%s5759_s5 + $0x118] sm:$0xff] }
 0x578   : > { %2758 = vmatpush2.bf16.msra.mxu1 %v4426_v10  ;;  %2718 = vmatprep.subr.bf16.mxu0 %v4417_v11  ;;  %v4369_v10 = vcombine.high %v1955_v4, %v1959_v5  ;;  %v4371_v11 = vcombine.high %v1956_v6, %v1960_v7  ;;  %v1930_v61 = vld [vmem:[%s5759_s5 + $0x138] sm:$0xff] }
 0x579   : > { %2759 = vmatprep.subr.bf16.mxu1 %v4419_v12  ;;  %v4368_v12 = vcombine.low %v1955_v4, %v1959_v5  ;;  %v1917_v4 = vld [vmem:[%s5759_s5 + $0xd0] sm:$0xff] }
 0x57a   : > { %v1921_v5 = vld [vmem:[%s5759_s5 + $0xf0] sm:$0xff] }
 0x57b   : > { %2719 = vmatpush2.bf16.msra.mxu0 %v4416_v13  ;;  %v4370_v13 = vcombine.low %v1956_v6, %v1960_v7  ;;  %v1918_v6 = vld [vmem:[%s5759_s5 + $0xd8] sm:$0xff] }
 0x57c   : > { %2760 = vmatpush2.bf16.msra.mxu1 %v4418_v14  ;;  %v1949_v14 = vld [vmem:[%s5759_s5 + $0x1d0] sm:$0xff]  ;;  %v1922_v7 = vld [vmem:[%s5759_s5 + $0xf8] sm:$0xff] }
 0x5e3   : > { %v1854_v15 = vpop.xlane.xlu0 %1853 }
 0x5e4   : > { %v1856_v16 = vmul.f32 0.00390625, %v1854_v15  ;;  %v1953_v15 = vld [vmem:[%s5759_s5 + $0x1f0] sm:$0xff] }
 0x5e6   : > { %v6048_v17 = vsub.f32 %v6000_v50, %v1856_v16  ;;  %v6051_v18 = vsub.f32 %v6003_v51, %v1856_v16  ;;  %v4409_v50 = vcombine.high %v1995_v22, %v1999_v23  ;;  %v2000_v51 = vld [vmem:[%s5759_s5 + $0x368] sm:$0xff]  ;;  %v1950_v16 = vld [vmem:[%s5759_s5 + $0x1d8] sm:$0xff] }
 0x5e7   : > { %v4410_v26 = vcombine.low %v1996_v24, %v2000_v51  ;;  %v4411_v27 = vcombine.high %v1996_v24, %v2000_v51 }
 0x5e8   : > { %v1859_v19 = vmul.f32 %v6048_v17, %v6048_v17  ;;  %v1860_v20 = vmul.f32 %v6051_v18, %v6051_v18  ;;  %2720 = vmatprep.subr.bf16.mxu0 %v4409_v50 }
 0x5e9   : > { %2761 = vmatprep.subr.bf16.mxu1 %v4411_v27  ;;  %2721 = vmatpush2.bf16.msra.mxu0 %v4408_v25  ;;  %v6086_v25 = vsub.s32 5, %v5914_v40 }
 0x5ea   : > { %v1861_v21 = vadd.f32 %v1860_v20, %v1859_v19  ;;  %2762 = vmatpush2.bf16.msra.mxu1 %v4410_v26  ;;  %2722 = vmatprep.subr.bf16.mxu0 %v4401_v32  ;;  %v4365_v19 = vcombine.high %v1949_v14, %v1953_v15  ;;  %v1954_v20 = vld [vmem:[%s5759_s5 + $0x1f8] sm:$0xff]  ;;  %v6089_v26 = vsub.s32 6, %v5914_v40 }
 0x5eb   : > { %2763 = vmatprep.subr.bf16.mxu1 %v4403_v44  ;;  %v4366_v22 = vcombine.low %v1950_v16, %v1954_v20  ;;  %v4367_v23 = vcombine.high %v1950_v16, %v1954_v20  ;;  %v1876_v27 = vrot.slane %v5930_v47, %v6086_v25  ;;  %v1872_v28 = vrot.slane %v5920_v42, %v6086_v25 }
 0x5ec   : > { %1862 = vadd.xlane.f32.xlu1 %v1861_v21  ;;  %v4364_v21 = vcombine.low %v1949_v14, %v1953_v15  ;;  %v1882_v33 = vrot.slane %v5920_v42, %v6089_v26  ;;  %v1933_v42 = vld [vmem:[%s5759_s5 + $0x150] sm:$0xff]  ;;  %v1910_v14 = vld [vmem:[%s5759_s5 + $0x98] sm:$0xff]  ;;  %v4332_v16 = vcombine.low %v1917_v4, %v1921_v5 }
 0x5ed   : > { %2723 = vmatpush2.bf16.msra.mxu0 %v4400_v31  ;;  %v1886_v31 = vrot.slane %v5930_v47, %v6089_v26  ;;  %v1914_v15 = vld [vmem:[%s5759_s5 + $0xb8] sm:$0xff] }
 0x5ee   : > { %2764 = vmatpush2.bf16.msra.mxu1 %v4402_v37  ;;  %2724 = vmatprep.subr.bf16.mxu0 %v4393_v45  ;;  %v1941_v45 = vld [vmem:[%s5759_s5 + $0x190] sm:$0xff] }
 0x5ef   : > { %2765 = vmatprep.subr.bf16.mxu1 %v4395_v53  ;;  %v4357_v52 = vcombine.high %v1941_v45, %v1945_v46 }
 0x5f1   : > { %2725 = vmatpush2.bf16.msra.mxu0 %v4392_v57  ;;  %v4356_v57 = vcombine.low %v1941_v45, %v1945_v46 }
 0x5f2   : > { %2766 = vmatpush2.bf16.msra.mxu1 %v4394_v3  ;;  %2726 = vmatprep.subr.bf16.mxu0 %v4385_v58  ;;  %v4349_v58 = vcombine.high %v1933_v42, %v1937_v54 }
 0x5f3   : > { %2767 = vmatprep.subr.bf16.mxu1 %v4387_v59  ;;  %v4351_v59 = vcombine.high %v1934_v55, %v1938_v56 }
 0x5f5   : > { %2727 = vmatpush2.bf16.msra.mxu0 %v4384_v62  ;;  %v4348_v62 = vcombine.low %v1933_v42, %v1937_v54  ;;  %v2018_v42 = vld [vmem:[%s5759_s5 + $0x3f8] sm:$0xff] }
 0x5f6   : > { %2768 = vmatpush2.bf16.msra.mxu1 %v4386_v63  ;;  %2728 = vmatprep.subr.bf16.mxu0 %v4377_v0  ;;  %v4350_v63 = vcombine.low %v1934_v55, %v1938_v56  ;;  %v4341_v0 = vcombine.high %v1925_v38, %v1929_v48  ;;  %v2005_v56 = vld [vmem:[%s5759_s5 + $0x390] sm:$0xff] }
 0x5f7   : > { %2769 = vmatprep.subr.bf16.mxu1 %v4379_v1  ;;  %v4343_v1 = vcombine.high %v1926_v60, %v1930_v61 }
 0x5f9   : > { %2729 = vmatpush2.bf16.msra.mxu0 %v4376_v8  ;;  %v4340_v8 = vcombine.low %v1925_v38, %v1929_v48 }
 0x5fa   : > { %2770 = vmatpush2.bf16.msra.mxu1 %v4378_v9  ;;  %2730 = vmatprep.subr.bf16.mxu0 %v4369_v10  ;;  %v4342_v9 = vcombine.low %v1926_v60, %v1930_v61  ;;  %v4333_v10 = vcombine.high %v1917_v4, %v1921_v5  ;;  %v1997_v61 = vld [vmem:[%s5759_s5 + $0x350] sm:$0xff] }
 0x5fb   : > { %2771 = vmatprep.subr.bf16.mxu1 %v4371_v11  ;;  %v4335_v11 = vcombine.high %v1918_v6, %v1922_v7 }
 0x5fd   : > { %2731 = vmatpush2.bf16.msra.mxu0 %v4368_v12  ;;  %v1909_v12 = vld [vmem:[%s5759_s5 + $0x90] sm:$0xff] }
 0x5fe   : > { %2772 = vmatpush2.bf16.msra.mxu1 %v4370_v13  ;;  %2782 = vmatprep.subr.bf16.mxu0 %v4365_v19  ;;  %v1913_v13 = vld [vmem:[%s5759_s5 + $0xb0] sm:$0xff]  ;;  %v4334_v19 = vcombine.low %v1918_v6, %v1922_v7 }
 0x5ff   : > { %2823 = vmatprep.subr.bf16.mxu1 %v4367_v23  ;;  %v4325_v20 = vcombine.high %v1909_v12, %v1913_v13  ;;  %v1905_v23 = vld [vmem:[%s5759_s5 + $0x70] sm:$0xff] }
 0x600   : > { %v1989_v7 = vld [vmem:[%s5759_s5 + $0x310] sm:$0xff] }
 0x675   : > { %v1863_v24 = vpop.xlane.xlu1 %1862 }
 0x676   : > { %v1864_v50 = vmul.f32 0.00390625, %v1863_v24  ;;  %v1902_v24 = vld [vmem:[%s5759_s5 + $0x58] sm:$0xff] }
 0x678   : > { %v1865_v51 = vadd.f32 1e-05, %v1864_v50  ;;  %v1906_v50 = vld [vmem:[%s5759_s5 + $0x78] sm:$0xff] }
 0x67a   : > { %5135 = vrsqrt.f32 %v1865_v51  ;;  %v4324_v51 = vcombine.low %v1909_v12, %v1913_v13 }
 0x687   : > { %v5136_v29 = vpop.eup %5135 }
 0x688   : > { %v1868_v30 = vmul.f32 %v5136_v29, %v6051_v18  ;;  %v1867_v32 = vmul.f32 %v5136_v29, %v6048_v17  ;;  %v1942_v18 = vld [vmem:[%s5759_s5 + $0x198] sm:$0xff]  ;;  %v4319_v29 = vcombine.high %v1902_v24, %v1906_v50 }
 0x689   : > { %v4359_v53 = vcombine.high %v1942_v18, %v1946_v49  ;;  %v4358_v3 = vcombine.low %v1942_v18, %v1946_v49  ;;  %v2013_v18 = vld [vmem:[%s5759_s5 + $0x3d0] sm:$0xff] }
 0x68a   : > { %v1878_v35 = vmul.f32 %v1876_v27, %v1868_v30  ;;  %v1877_v36 = vmul.f32 %v1872_v28, %v1867_v32  ;;  %v4326_v27 = vcombine.low %v1910_v14, %v1914_v15  ;;  %v1893_v30 = vld [vmem:[%s5759_s5 + $0x10] sm:$0xff]  ;;  %v1894_v32 = vld [vmem:[%s5759_s5 + $0x18] sm:$0xff] }
 0x68b   : > { %v2017_v49 = vld [vmem:[%s5759_s5 + $0x3f0] sm:$0xff] }
 0x68c   : > { %v6101_v37 = vadd.f32 %v1886_v31, %v1878_v35  ;;  %v6103_v44 = vadd.f32 %v1882_v33, %v1877_v36  ;;  %v1897_v31 = vld [vmem:[%s5759_s5 + $0x30] sm:$0xff]  ;;  %v1898_v33 = vld [vmem:[%s5759_s5 + $0x38] sm:$0xff]  ;;  %v4318_v36 = vcombine.low %v1902_v24, %v1906_v50  ;;  %v4429_v54 = vcombine.high %v2013_v18, %v2017_v49 }
 0x68d   : > { %v4309_v45 = vcombine.high %v1893_v30, %v1897_v31  ;;  %v4311_v46 = vcombine.high %v1894_v32, %v1898_v33  ;;  %v1973_v50 = vld [vmem:[%s5759_s5 + $0x290] sm:$0xff] }
 0x68e   : > { %v1890_v47 = vpack.c.bf16 %v6101_v37, %v6101_v37  ;;  %v6113_v17 = vpack.c.bf16 %v6103_v44, %v6103_v44 }
 0x690   : > { %2732 = vmatprep.mubr.bf16.mxu0 %v1890_v47  ;;  %2773 = vmatprep.mubr.bf16.mxu1 %v1890_v47 }
 0x691   : > { %2733 = vmatmul.mubr.bf16.vlgmr.msra.gmra.mxu0 %v6113_v17  ;;  %2774 = vmatmul.mubr.bf16.vlgmr.msra.gmra.mxu1 %v6113_v17 }
 0x692   : > { %2783 = vmatpush1.bf16.msra.mxu0 %v4364_v21  ;;  %2824 = vmatpush1.bf16.msra.mxu1 %v4366_v22  ;;  %v4327_v21 = vcombine.high %v1910_v14, %v1914_v15  ;;  %v1901_v22 = vld [vmem:[%s5759_s5 + $0x50] sm:$0xff] }
 0x693   : > { %2814 = vmatprep.mubr.bf16.mxu0 %v1890_v47  ;;  %2855 = vmatprep.mubr.bf16.mxu1 %v1890_v47  ;;  %v4317_v28 = vcombine.high %v1901_v22, %v1905_v23  ;;  %v4316_v35 = vcombine.low %v1901_v22, %v1905_v23  ;;  %v2014_v47 = vld [vmem:[%s5759_s5 + $0x3d8] sm:$0xff]  ;;  %v1981_v15 = vld [vmem:[%s5759_s5 + $0x2d0] sm:$0xff] }
 0x694   : > { %2784 = vmatprep.subr.bf16.mxu0 %v4357_v52  ;;  %2825 = vmatprep.subr.bf16.mxu1 %v4359_v53  ;;  %v4308_v52 = vcombine.low %v1893_v30, %v1897_v31  ;;  %v4310_v53 = vcombine.low %v1894_v32, %v1898_v33  ;;  %v4431_v55 = vcombine.high %v2014_v47, %v2018_v42  ;;  %v1965_v33 = vld [vmem:[%s5759_s5 + $0x250] sm:$0xff] }
 0x695   : > { %v4430_v38 = vcombine.low %v2014_v47, %v2018_v42  ;;  %v1957_v42 = vld [vmem:[%s5759_s5 + $0x210] sm:$0xff] }
 0x696   : > { %2785 = vmatpush1.bf16.msra.mxu0 %v4356_v57  ;;  %2826 = vmatpush1.bf16.msra.mxu1 %v4358_v3  ;;  %v2009_v57 = vld [vmem:[%s5759_s5 + $0x3b0] sm:$0xff]  ;;  %v2006_v3 = vld [vmem:[%s5759_s5 + $0x398] sm:$0xff] }
 0x697   : > { %2786 = vmatprep.subr.bf16.mxu0 %v4349_v58  ;;  %2827 = vmatprep.subr.bf16.mxu1 %v4351_v59  ;;  %v2010_v58 = vld [vmem:[%s5759_s5 + $0x3b8] sm:$0xff]  ;;  %v4428_v59 = vcombine.low %v2013_v18, %v2017_v49  ;;  %v4421_v48 = vcombine.high %v2005_v56, %v2009_v57 }
 0x698   : > { %v4423_v60 = vcombine.high %v2006_v3, %v2010_v58  ;;  %v4422_v4 = vcombine.low %v2006_v3, %v2010_v58 }
 0x69a   : > { %2787 = vmatpush1.bf16.msra.mxu0 %v4348_v62  ;;  %2828 = vmatpush1.bf16.msra.mxu1 %v4350_v63  ;;  %v2001_v62 = vld [vmem:[%s5759_s5 + $0x370] sm:$0xff]  ;;  %v1998_v63 = vld [vmem:[%s5759_s5 + $0x358] sm:$0xff] }
 0x69b   : > { %2788 = vmatprep.subr.bf16.mxu0 %v4341_v0  ;;  %2829 = vmatprep.subr.bf16.mxu1 %v4343_v1  ;;  %v2002_v0 = vld [vmem:[%s5759_s5 + $0x378] sm:$0xff]  ;;  %v4420_v1 = vcombine.low %v2005_v56, %v2009_v57  ;;  %v4413_v5 = vcombine.high %v1997_v61, %v2001_v62 }
 0x69c   : > { %v4415_v6 = vcombine.high %v1998_v63, %v2002_v0  ;;  %v4414_v12 = vcombine.low %v1998_v63, %v2002_v0  ;;  %v4946_v63 = vld [vmem:[%s5761_s0 + $0x164] ss:$8 sps:$4 sm:$0xff]   ;;  %v4941_v0 = vld [vmem:[%s5761_s0 + $0x60] ss:$8 sps:$4 sm:$0xff]  }
 0x69e   : > { %2789 = vmatpush1.bf16.msra.mxu0 %v4340_v8  ;;  %2830 = vmatpush1.bf16.msra.mxu1 %v4342_v9  ;;  %v1993_v8 = vld [vmem:[%s5759_s5 + $0x330] sm:$0xff]  ;;  %v1990_v9 = vld [vmem:[%s5759_s5 + $0x318] sm:$0xff] }
 0x69f   : > { %2790 = vmatprep.subr.bf16.mxu0 %v4333_v10  ;;  %2831 = vmatprep.subr.bf16.mxu1 %v4335_v11  ;;  %v1994_v10 = vld [vmem:[%s5759_s5 + $0x338] sm:$0xff]  ;;  %v4412_v11 = vcombine.low %v1997_v61, %v2001_v62  ;;  %v4405_v13 = vcombine.high %v1989_v7, %v1993_v8  ;;  %v4943_v62 = vld [vmem:[%s5761_s0 + $0x64] ss:$8 sps:$4 sm:$0xff]  }
 0x6a0   : > { %v4407_v14 = vcombine.high %v1990_v9, %v1994_v10  ;;  %v4406_v22 = vcombine.low %v1990_v9, %v1994_v10  ;;  %v4938_v61 = vld [vmem:[%s5761_s0 + $0x170] ss:$8 sps:$4 sm:$0xff]   ;;  %v4953_v9 = vld [vmem:[%s5761_s0 + $0x40] ss:$8 sps:$4 sm:$0xff]  }
 0x6a1   : > { %v4956_v10 = vld [vmem:[%s5761_s0 + $0x140] ss:$8 sps:$4 sm:$0xff]  }
 0x6a2   : > { %2791 = vmatpush1.bf16.msra.mxu0 %v4332_v16  ;;  %2832 = vmatpush1.bf16.msra.mxu1 %v4334_v19  ;;  %v1985_v16 = vld [vmem:[%s5759_s5 + $0x2f0] sm:$0xff]  ;;  %v1982_v19 = vld [vmem:[%s5759_s5 + $0x2d8] sm:$0xff] }
 0x6a3   : > { %2792 = vmatprep.subr.bf16.mxu0 %v4325_v20  ;;  %2833 = vmatprep.subr.bf16.mxu1 %v4327_v21  ;;  %v1986_v20 = vld [vmem:[%s5759_s5 + $0x2f8] sm:$0xff]  ;;  %v4404_v21 = vcombine.low %v1989_v7, %v1993_v8  ;;  %v4397_v23 = vcombine.high %v1981_v15, %v1985_v16  ;;  %v4958_v8 = vld [vmem:[%s5761_s0 + $0x144] ss:$8 sps:$4 sm:$0xff]  }
 0x6a4   : > { %v4399_v24 = vcombine.high %v1982_v19, %v1986_v20  ;;  %v4398_v30 = vcombine.low %v1982_v19, %v1986_v20  ;;  %v4950_v7 = vld [vmem:[%s5761_s0 + $0x150] ss:$8 sps:$4 sm:$0xff]   ;;  %v4965_v19 = vld [vmem:[%s5761_s0 + $0x20] ss:$8 sps:$4 sm:$0xff]  }
 0x6a5   : > { %v4968_v20 = vld [vmem:[%s5761_s0 + $0x120] ss:$8 sps:$4 sm:$0xff]  }
 0x6a6   : > { %2793 = vmatpush1.bf16.msra.mxu0 %v4324_v51  ;;  %2834 = vmatpush1.bf16.msra.mxu1 %v4326_v27  ;;  %v1977_v51 = vld [vmem:[%s5759_s5 + $0x2b0] sm:$0xff]  ;;  %v1974_v27 = vld [vmem:[%s5759_s5 + $0x298] sm:$0xff] }
 0x6a7   : > { %2794 = vmatprep.subr.bf16.mxu0 %v4317_v28  ;;  %2835 = vmatprep.subr.bf16.mxu1 %v4319_v29  ;;  %v1978_v28 = vld [vmem:[%s5759_s5 + $0x2b8] sm:$0xff]  ;;  %v4396_v29 = vcombine.low %v1981_v15, %v1985_v16  ;;  %v4389_v31 = vcombine.high %v1973_v50, %v1977_v51  ;;  %v4967_v15 = vld [vmem:[%s5761_s0 + $0x24] ss:$8 sps:$4 sm:$0xff]  }
 0x6a8   : > { %v4391_v32 = vcombine.high %v1974_v27, %v1978_v28  ;;  %v4390_v18 = vcombine.low %v1974_v27, %v1978_v28  ;;  %v4970_v16 = vld [vmem:[%s5761_s0 + $0x124] ss:$8 sps:$4 sm:$0xff]   ;;  %v4977_v27 = vld [vmem:[%s5761_s0] ss:$8 sps:$4 sm:$0xff]  }
 0x6a9   : > { %v4980_v28 = vld [vmem:[%s5761_s0 + $0x100] ss:$8 sps:$4 sm:$0xff]  }
 0x6aa   : > { %2795 = vmatpush1.bf16.msra.mxu0 %v4316_v35  ;;  %2836 = vmatpush1.bf16.msra.mxu1 %v4318_v36  ;;  %v1969_v35 = vld [vmem:[%s5759_s5 + $0x270] sm:$0xff]  ;;  %v1966_v36 = vld [vmem:[%s5759_s5 + $0x258] sm:$0xff] }
 0x6ab   : > { %2796 = vmatprep.subr.bf16.mxu0 %v4309_v45  ;;  %2837 = vmatprep.subr.bf16.mxu1 %v4311_v46  ;;  %v1970_v45 = vld [vmem:[%s5759_s5 + $0x278] sm:$0xff]  ;;  %v4388_v46 = vcombine.low %v1973_v50, %v1977_v51  ;;  %v4381_v49 = vcombine.high %v1965_v33, %v1969_v35  ;;  %v4979_v50 = vld [vmem:[%s5761_s0 + $0x4] ss:$8 sps:$4 sm:$0xff]  }
 0x6ac   : > { %v4383_v47 = vcombine.high %v1966_v36, %v1970_v45  ;;  %v4382_v56 = vcombine.low %v1966_v36, %v1970_v45  ;;  %v4982_v51 = vld [vmem:[%s5761_s0 + $0x104] ss:$8 sps:$4 sm:$0xff]   ;;  %v4989_v36 = vld [vmem:[%s5761_s0 + $0xe0] ss:$8 sps:$4 sm:$0xff]  }
 0x6ad   : > { %v4992_v45 = vld [vmem:[%s5761_s0 + $0x1e0] ss:$8 sps:$4 sm:$0xff]  }
 0x6ae   : > { %2797 = vmatpush1.bf16.msra.mxu0 %v4308_v52  ;;  %2838 = vmatpush1.bf16.msra.mxu1 %v4310_v53  ;;  %v1961_v52 = vld [vmem:[%s5759_s5 + $0x230] sm:$0xff]  ;;  %v1958_v53 = vld [vmem:[%s5759_s5 + $0x218] sm:$0xff] }
 0x6af   : > { %2798 = vmatprep.subr.bf16.mxu0 %v4429_v54  ;;  %2839 = vmatprep.subr.bf16.mxu1 %v4431_v55  ;;  %v1962_v54 = vld [vmem:[%s5759_s5 + $0x238] sm:$0xff]  ;;  %v4380_v55 = vcombine.low %v1965_v33, %v1969_v35  ;;  %v4373_v57 = vcombine.high %v1957_v42, %v1961_v52  ;;  %v4372_v58 = vcombine.low %v1957_v42, %v1961_v52  ;;  %v4991_v33 = vld [vmem:[%s5761_s0 + $0xe4] ss:$8 sps:$4 sm:$0xff]  }
 0x6b0   : > { %v4375_v3 = vcombine.high %v1958_v53, %v1962_v54  ;;  %v4994_v35 = vld [vmem:[%s5761_s0 + $0x1e4] ss:$8 sps:$4 sm:$0xff]  }
 0x6b1   : > { %v5003_v42 = vld [vmem:[%s5761_s0 + $0xc4] ss:$8 sps:$4 sm:$0xff]  }
 0x6b2   : > { %2799 = vmatpush2.bf16.msra.mxu0 %v4428_v59  ;;  %2840 = vmatpush2.bf16.msra.mxu1 %v4430_v38  ;;  %v4374_v59 = vcombine.low %v1958_v53, %v1962_v54  ;;  %v4937_v38 = vld [vmem:[%s5761_s0 + $0x74] ss:$8 sps:$4 sm:$0xff]   ;;  %v5006_v52 = vld [vmem:[%s5761_s0 + $0x1c4] ss:$8 sps:$4 sm:$0xff]   ;;  %v5001_v53 = vld [vmem:[%s5761_s0 + $0xc0] ss:$8 sps:$4 sm:$0xff]  }
 0x6b3   : > { %2800 = vmatprep.subr.bf16.mxu0 %v4421_v48  ;;  %2841 = vmatprep.subr.bf16.mxu1 %v4423_v60  ;;  %v4940_v48 = vld [vmem:[%s5761_s0 + $0x174] ss:$8 sps:$4 sm:$0xff]   ;;  %v4935_v60 = vld [vmem:[%s5761_s0 + $0x70] ss:$8 sps:$4 sm:$0xff]   ;;  %v5004_v54 = vld [vmem:[%s5761_s0 + $0x1c0] ss:$8 sps:$4 sm:$0xff]  }
 0x6b6   : > { %2801 = vmatpush2.bf16.msra.mxu0 %v4420_v1  ;;  %2842 = vmatpush2.bf16.msra.mxu1 %v4422_v4  ;;  %v4944_v1 = vld [vmem:[%s5761_s0 + $0x160] ss:$8 sps:$4 sm:$0xff]   ;;  %v4949_v4 = vld [vmem:[%s5761_s0 + $0x54] ss:$8 sps:$4 sm:$0xff]  }
 0x6b7   : > { %2802 = vmatprep.subr.bf16.mxu0 %v4413_v5  ;;  %2843 = vmatprep.subr.bf16.mxu1 %v4415_v6  ;;  %v4952_v5 = vld [vmem:[%s5761_s0 + $0x154] ss:$8 sps:$4 sm:$0xff]   ;;  %v4947_v6 = vld [vmem:[%s5761_s0 + $0x50] ss:$8 sps:$4 sm:$0xff]  }
 0x6ba   : > { %2803 = vmatpush2.bf16.msra.mxu0 %v4412_v11  ;;  %2844 = vmatpush2.bf16.msra.mxu1 %v4414_v12  ;;  %v4961_v11 = vld [vmem:[%s5761_s0 + $0x34] ss:$8 sps:$4 sm:$0xff]  }
 0x6bb   : > { %2804 = vmatprep.subr.bf16.mxu0 %v4405_v13  ;;  %2845 = vmatprep.subr.bf16.mxu1 %v4407_v14  ;;  %v4964_v12 = vld [vmem:[%s5761_s0 + $0x134] ss:$8 sps:$4 sm:$0xff]   ;;  %v4959_v13 = vld [vmem:[%s5761_s0 + $0x30] ss:$8 sps:$4 sm:$0xff]  }
 0x6bc   : > { %v4962_v14 = vld [vmem:[%s5761_s0 + $0x130] ss:$8 sps:$4 sm:$0xff]  }
 0x6be   : > { %2805 = vmatpush2.bf16.msra.mxu0 %v4404_v21  ;;  %2846 = vmatpush2.bf16.msra.mxu1 %v4406_v22  ;;  %v4973_v21 = vld [vmem:[%s5761_s0 + $0x14] ss:$8 sps:$4 sm:$0xff]  }
 0x6bf   : > { %2806 = vmatprep.subr.bf16.mxu0 %v4397_v23  ;;  %2847 = vmatprep.subr.bf16.mxu1 %v4399_v24  ;;  %v4976_v22 = vld [vmem:[%s5761_s0 + $0x114] ss:$8 sps:$4 sm:$0xff]   ;;  %v4971_v23 = vld [vmem:[%s5761_s0 + $0x10] ss:$8 sps:$4 sm:$0xff]  }
 0x6c0   : > { %v4974_v24 = vld [vmem:[%s5761_s0 + $0x110] ss:$8 sps:$4 sm:$0xff]  }
 0x6c2   : > { %2807 = vmatpush2.bf16.msra.mxu0 %v4396_v29  ;;  %2848 = vmatpush2.bf16.msra.mxu1 %v4398_v30  ;;  %v4985_v29 = vld [vmem:[%s5761_s0 + $0xf4] ss:$8 sps:$4 sm:$0xff]  }
 0x6c3   : > { %2808 = vmatprep.subr.bf16.mxu0 %v4389_v31  ;;  %2849 = vmatprep.subr.bf16.mxu1 %v4391_v32  ;;  %v4988_v30 = vld [vmem:[%s5761_s0 + $0x1f4] ss:$8 sps:$4 sm:$0xff]   ;;  %v4983_v31 = vld [vmem:[%s5761_s0 + $0xf0] ss:$8 sps:$4 sm:$0xff]  }
 0x6c4   : > { %v4986_v32 = vld [vmem:[%s5761_s0 + $0x1f0] ss:$8 sps:$4 sm:$0xff]  }
 0x6c6   : > { %2809 = vmatpush2.bf16.msra.mxu0 %v4388_v46  ;;  %2850 = vmatpush2.bf16.msra.mxu1 %v4390_v18  ;;  %v4997_v46 = vld [vmem:[%s5761_s0 + $0xd4] ss:$8 sps:$4 sm:$0xff]  }
 0x6c7   : > { %2810 = vmatprep.subr.bf16.mxu0 %v4381_v49  ;;  %2851 = vmatprep.subr.bf16.mxu1 %v4383_v47  ;;  %v5000_v18 = vld [vmem:[%s5761_s0 + $0x1d4] ss:$8 sps:$4 sm:$0xff]   ;;  %v4995_v49 = vld [vmem:[%s5761_s0 + $0xd0] ss:$8 sps:$4 sm:$0xff]  }
 0x6c8   : > { %v4998_v47 = vld [vmem:[%s5761_s0 + $0x1d0] ss:$8 sps:$4 sm:$0xff]  }
 0x6ca   : > { %2811 = vmatpush2.bf16.msra.mxu0 %v4380_v55  ;;  %2852 = vmatpush2.bf16.msra.mxu1 %v4382_v56  ;;  %v5009_v55 = vld [vmem:[%s5761_s0 + $0xb4] ss:$8 sps:$4 sm:$0xff]  }
 0x6cb   : > { %2812 = vmatprep.subr.bf16.mxu0 %v4373_v57  ;;  %2853 = vmatprep.subr.bf16.mxu1 %v4375_v3  ;;  %v5012_v56 = vld [vmem:[%s5761_s0 + $0x1b4] ss:$8 sps:$4 sm:$0xff]   ;;  %v5007_v57 = vld [vmem:[%s5761_s0 + $0xb0] ss:$8 sps:$4 sm:$0xff]  }
 0x6cc   : > { %v5010_v3 = vld [vmem:[%s5761_s0 + $0x1b0] ss:$8 sps:$4 sm:$0xff]  }
 0x6ce   : > { %2813 = vmatpush2.bf16.msra.mxu0 %v4372_v58  ;;  %2854 = vmatpush2.bf16.msra.mxu1 %v4374_v59  ;;  %v5015_v58 = vld [vmem:[%s5761_s0 + $0xa4] ss:$8 sps:$4 sm:$0xff]  }
 0x6cf   : > { %3656 = vmatprep.subr.bf16.mxu0 %v4937_v38  ;;  %3697 = vmatprep.subr.bf16.mxu1 %v4940_v48  ;;  %v5018_v59 = vld [vmem:[%s5761_s0 + $0x1a4] ss:$8 sps:$4 sm:$0xff]   ;;  %v5013_v38 = vld [vmem:[%s5761_s0 + $0xa0] ss:$8 sps:$4 sm:$0xff]  }
 0x6d0   : > { %v5016_v48 = vld [vmem:[%s5761_s0 + $0x1a0] ss:$8 sps:$4 sm:$0xff]  }
 0x6d1   : > { %2815 = vmatmul.mubr.bf16.vlgmr.msra.gmra.mxu0 %v6113_v17  ;;  %2856 = vmatmul.mubr.bf16.vlgmr.msra.gmra.mxu1 %v6113_v17  ;;  %v4955_v17 = vld [vmem:[%s5761_s0 + $0x44] ss:$8 sps:$4 sm:$0xff]  }
 0x6d2   : > { %3657 = vmatpush1.bf16.msra.mxu0 %v4935_v60  ;;  %3698 = vmatpush1.bf16.msra.mxu1 %v4938_v61  ;;  %v5021_v60 = vld [vmem:[%s5761_s0 + $0x94] ss:$8 sps:$4 sm:$0xff]  }
 0x6d3   : > { %3658 = vmatprep.subr.bf16.mxu0 %v4943_v62  ;;  %3699 = vmatprep.subr.bf16.mxu1 %v4946_v63  ;;  %v5024_v61 = vld [vmem:[%s5761_s0 + $0x194] ss:$8 sps:$4 sm:$0xff]   ;;  %v5019_v62 = vld [vmem:[%s5761_s0 + $0x90] ss:$8 sps:$4 sm:$0xff]  }
 0x6d4   : > { %v5022_v63 = vld [vmem:[%s5761_s0 + $0x190] ss:$8 sps:$4 sm:$0xff]  }
 0x6d6   : > { %3659 = vmatpush1.bf16.msra.mxu0 %v4941_v0  ;;  %3700 = vmatpush1.bf16.msra.mxu1 %v4944_v1  ;;  %v5027_v0 = vld [vmem:[%s5761_s0 + $0x84] ss:$8 sps:$4 sm:$0xff]  }
 0x6d7   : > { %3660 = vmatprep.subr.bf16.mxu0 %v4949_v4  ;;  %3701 = vmatprep.subr.bf16.mxu1 %v4952_v5  ;;  %v5030_v1 = vld [vmem:[%s5761_s0 + $0x184] ss:$8 sps:$4 sm:$0xff]   ;;  %v5025_v4 = vld [vmem:[%s5761_s0 + $0x80] ss:$8 sps:$4 sm:$0xff]  }
 0x6d8   : > { %v5028_v5 = vld [vmem:[%s5761_s0 + $0x180] ss:$8 sps:$4 sm:$0xff]  }
 0x6da   : > { %3661 = vmatpush1.bf16.msra.mxu0 %v4947_v6  ;;  %3702 = vmatpush1.bf16.msra.mxu1 %v4950_v7  ;;  %v5033_v6 = vld [vmem:[%s5761_s0 + $0x274] ss:$8 sps:$4 sm:$0xff]  }
 0x6db   : > { %3662 = vmatprep.subr.bf16.mxu0 %v4955_v17  ;;  %3703 = vmatprep.subr.bf16.mxu1 %v4958_v8  ;;  %v5036_v7 = vld [vmem:[%s5761_s0 + $0x374] ss:$8 sps:$4 sm:$0xff]  }
 0x6dc   : > { %v6242_v17 = vld [vmem:[%s5794_s7] sm:$0xff]  ;;  %s6481_s7 = sld [smem:[#allocation24_spill]] }
 0x6dd   : > { %v2023_v8 = vrot.slane %v6242_v17, %v5923_v43 }
 0x6de   : > { %3663 = vmatpush1.bf16.msra.mxu0 %v4953_v9  ;;  %3704 = vmatpush1.bf16.msra.mxu1 %v4956_v10  ;;  %v2031_v9 = vrot.slane %v6242_v17, %v5940_v2  ;;  %v2027_v10 = vrot.slane %v6242_v17, %v5917_v41 }
 0x6df   : > { %3664 = vmatprep.subr.bf16.mxu0 %v4961_v11  ;;  %3705 = vmatprep.subr.bf16.mxu1 %v4964_v12  ;;  %v2035_v11 = vrot.slane %v6242_v17, %v5993_v34 }
 0x6e2   : > { %3665 = vmatpush1.bf16.msra.mxu0 %v4959_v13  ;;  %3706 = vmatpush1.bf16.msra.mxu1 %v4962_v14  ;;  %p4562_p3 = scmp.ne.s32.totalorder %s6481_s7, 1 }
 0x6e3   : > { %3666 = vmatprep.subr.bf16.mxu0 %v4967_v15  ;;  %3707 = vmatprep.subr.bf16.mxu1 %v4970_v16 }
 0x6e6   : > { %3667 = vmatpush1.bf16.msra.mxu0 %v4965_v19  ;;  %3708 = vmatpush1.bf16.msra.mxu1 %v4968_v20 }
 0x6e7   : > { %3668 = vmatprep.subr.bf16.mxu0 %v4973_v21  ;;  %3709 = vmatprep.subr.bf16.mxu1 %v4976_v22 }
 0x6ea   : > { %3669 = vmatpush1.bf16.msra.mxu0 %v4971_v23  ;;  %3710 = vmatpush1.bf16.msra.mxu1 %v4974_v24 }
 0x6eb   : > { %3670 = vmatprep.subr.bf16.mxu0 %v4979_v50  ;;  %3711 = vmatprep.subr.bf16.mxu1 %v4982_v51 }
 0x6ee   : > { %3671 = vmatpush1.bf16.msra.mxu0 %v4977_v27  ;;  %3712 = vmatpush1.bf16.msra.mxu1 %v4980_v28  ;;  %v5031_v28 = vld [vmem:[%s5761_s0 + $0x270] ss:$8 sps:$4 sm:$0xff]  }
 0x6ef   : > { %3672 = vmatprep.subr.bf16.mxu0 %v4985_v29  ;;  %3713 = vmatprep.subr.bf16.mxu1 %v4988_v30  ;;  %v5034_v29 = vld [vmem:[%s5761_s0 + $0x370] ss:$8 sps:$4 sm:$0xff]  }
 0x6f2   : > { %3673 = vmatpush2.bf16.msra.mxu0 %v4983_v31  ;;  %3714 = vmatpush2.bf16.msra.mxu1 %v4986_v32  ;;  %v5039_v32 = vld [vmem:[%s5761_s0 + $0x264] ss:$8 sps:$4 sm:$0xff]  }
 0x6f3   : > { %3674 = vmatprep.subr.bf16.mxu0 %v4991_v33  ;;  %3715 = vmatprep.subr.bf16.mxu1 %v4994_v35  ;;  %v5042_v33 = vld [vmem:[%s5761_s0 + $0x364] ss:$8 sps:$4 sm:$0xff]   ;;  %v5037_v35 = vld [vmem:[%s5761_s0 + $0x260] ss:$8 sps:$4 sm:$0xff]  }
 0x6f6   : > { %3675 = vmatpush2.bf16.msra.mxu0 %v4989_v36  ;;  %3716 = vmatpush2.bf16.msra.mxu1 %v4992_v45  ;;  %v5040_v36 = vld [vmem:[%s5761_s0 + $0x360] ss:$8 sps:$4 sm:$0xff]   ;;  %v5045_v45 = vld [vmem:[%s5761_s0 + $0x254] ss:$8 sps:$4 sm:$0xff]  }
 0x6f7   : > { %3676 = vmatprep.subr.bf16.mxu0 %v4997_v46  ;;  %3717 = vmatprep.subr.bf16.mxu1 %v5000_v18  ;;  %v5048_v46 = vld [vmem:[%s5761_s0 + $0x354] ss:$8 sps:$4 sm:$0xff]   ;;  %v5043_v18 = vld [vmem:[%s5761_s0 + $0x250] ss:$8 sps:$4 sm:$0xff]  }
 0x6fa   : > { %3677 = vmatpush2.bf16.msra.mxu0 %v4995_v49  ;;  %3718 = vmatpush2.bf16.msra.mxu1 %v4998_v47  ;;  %v5046_v49 = vld [vmem:[%s5761_s0 + $0x350] ss:$8 sps:$4 sm:$0xff]   ;;  %v5051_v47 = vld [vmem:[%s5761_s0 + $0x244] ss:$8 sps:$4 sm:$0xff]  }
 0x6fb   : > { %3678 = vmatprep.subr.bf16.mxu0 %v5003_v42  ;;  %3719 = vmatprep.subr.bf16.mxu1 %v5006_v52  ;;  %v5054_v42 = vld [vmem:[%s5761_s0 + $0x344] ss:$8 sps:$4 sm:$0xff]   ;;  %v5049_v52 = vld [vmem:[%s5761_s0 + $0x240] ss:$8 sps:$4 sm:$0xff]  }
 0x6fe   : > { %3679 = vmatpush2.bf16.msra.mxu0 %v5001_v53  ;;  %3720 = vmatpush2.bf16.msra.mxu1 %v5004_v54  ;;  %v5052_v53 = vld [vmem:[%s5761_s0 + $0x340] ss:$8 sps:$4 sm:$0xff]   ;;  %v5057_v54 = vld [vmem:[%s5761_s0 + $0x234] ss:$8 sps:$4 sm:$0xff]  }
 0x6ff   : > { %3680 = vmatprep.subr.bf16.mxu0 %v5009_v55  ;;  %3721 = vmatprep.subr.bf16.mxu1 %v5012_v56  ;;  %v5060_v55 = vld [vmem:[%s5761_s0 + $0x334] ss:$8 sps:$4 sm:$0xff]   ;;  %v5055_v56 = vld [vmem:[%s5761_s0 + $0x230] ss:$8 sps:$4 sm:$0xff]  }
 0x702   : > { %3681 = vmatpush2.bf16.msra.mxu0 %v5007_v57  ;;  %3722 = vmatpush2.bf16.msra.mxu1 %v5010_v3  ;;  %v5058_v57 = vld [vmem:[%s5761_s0 + $0x330] ss:$8 sps:$4 sm:$0xff]   ;;  %v5063_v3 = vld [vmem:[%s5761_s0 + $0x224] ss:$8 sps:$4 sm:$0xff]  }
 0x703   : > { %3682 = vmatprep.subr.bf16.mxu0 %v5015_v58  ;;  %3723 = vmatprep.subr.bf16.mxu1 %v5018_v59  ;;  %v5066_v58 = vld [vmem:[%s5761_s0 + $0x324] ss:$8 sps:$4 sm:$0xff]   ;;  %v5061_v59 = vld [vmem:[%s5761_s0 + $0x220] ss:$8 sps:$4 sm:$0xff]  }
 0x706   : > { %3683 = vmatpush2.bf16.msra.mxu0 %v5013_v38  ;;  %3724 = vmatpush2.bf16.msra.mxu1 %v5016_v48  ;;  %v5064_v38 = vld [vmem:[%s5761_s0 + $0x320] ss:$8 sps:$4 sm:$0xff]   ;;  %v5069_v48 = vld [vmem:[%s5761_s0 + $0x214] ss:$8 sps:$4 sm:$0xff]  }
 0x707   : > { %3684 = vmatprep.subr.bf16.mxu0 %v5021_v60  ;;  %3725 = vmatprep.subr.bf16.mxu1 %v5024_v61  ;;  %v5072_v60 = vld [vmem:[%s5761_s0 + $0x314] ss:$8 sps:$4 sm:$0xff]   ;;  %v5067_v61 = vld [vmem:[%s5761_s0 + $0x210] ss:$8 sps:$4 sm:$0xff]  }
 0x70a   : > { %3685 = vmatpush2.bf16.msra.mxu0 %v5019_v62  ;;  %3726 = vmatpush2.bf16.msra.mxu1 %v5022_v63  ;;  %v5070_v62 = vld [vmem:[%s5761_s0 + $0x310] ss:$8 sps:$4 sm:$0xff]   ;;  %v5075_v63 = vld [vmem:[%s5761_s0 + $0x204] ss:$8 sps:$4 sm:$0xff]  }
 0x70b   : > { %3686 = vmatprep.subr.bf16.mxu0 %v5027_v0  ;;  %3727 = vmatprep.subr.bf16.mxu1 %v5030_v1  ;;  %v5078_v0 = vld [vmem:[%s5761_s0 + $0x304] ss:$8 sps:$4 sm:$0xff]   ;;  %v5073_v1 = vld [vmem:[%s5761_s0 + $0x200] ss:$8 sps:$4 sm:$0xff]  }
 0x70e   : > { %3687 = vmatpush2.bf16.msra.mxu0 %v5025_v4  ;;  %3728 = vmatpush2.bf16.msra.mxu1 %v5028_v5  ;;  %v5076_v4 = vld [vmem:[%s5761_s0 + $0x300] ss:$8 sps:$4 sm:$0xff]   ;;  %v5081_v5 = vld [vmem:[%s5761_s0 + $0x2f4] ss:$8 sps:$4 sm:$0xff]  }
 0x70f   : > { %3738 = vmatprep.subr.bf16.mxu0 %v5033_v6  ;;  %3779 = vmatprep.subr.bf16.mxu1 %v5036_v7  ;;  %v5084_v6 = vld [vmem:[%s5761_s0 + $0x3f4] ss:$8 sps:$4 sm:$0xff]   ;;  %v5079_v7 = vld [vmem:[%s5761_s0 + $0x2f0] ss:$8 sps:$4 sm:$0xff]  }
 0x751   : > { %v2734_v12 = vpop.f32.mrf.mxu0  ;;  %v2775_v13 = vpop.f32.mrf.mxu1 }
 0x752   : > { %v2735_v14 = vadd.f32 %v2734_v12, %v2023_v8  ;;  %v2776_v15 = vadd.f32 %v2775_v13, %v2031_v9  ;;  %v5082_v8 = vld [vmem:[%s5761_s0 + $0x3f0] ss:$8 sps:$4 sm:$0xff]   ;;  %v5087_v9 = vld [vmem:[%s5761_s0 + $0x2e4] ss:$8 sps:$4 sm:$0xff]   ;;  %v5088_v12 = vld [vmem:[%s5761_s0 + $0x3e0] ss:$8 sps:$4 sm:$0xff]  }
 0x753   : > { %v2736_v16 = vpop.f32.mrf.mxu0  ;;  %v2777_v19 = vpop.f32.mrf.mxu1  ;;  %v5093_v13 = vld [vmem:[%s5761_s0 + $0x2d4] ss:$8 sps:$4 sm:$0xff]  }
 0x754   : > { %v2737_v20 = vadd.f32 %v2736_v16, %v2027_v10  ;;  %v2778_v43 = vadd.f32 %v2777_v19, %v2035_v11  ;;  %v2864_v21 = vmax.f32 %v2735_v14, 0.0  ;;  %v2866_v2 = vmax.f32 %v2776_v15, 0.0  ;;  %v5090_v10 = vld [vmem:[%s5761_s0 + $0x3e4] ss:$8 sps:$4 sm:$0xff]   ;;  %v5085_v11 = vld [vmem:[%s5761_s0 + $0x2e0] ss:$8 sps:$4 sm:$0xff]  }
 0x755   : > { %v2738_v22 = vpop.f32.mrf.mxu0  ;;  %v2779_v23 = vpop.f32.mrf.mxu1  ;;  %v5096_v14 = vld [vmem:[%s5761_s0 + $0x3d4] ss:$8 sps:$4 sm:$0xff]   ;;  %v5091_v15 = vld [vmem:[%s5761_s0 + $0x2d0] ss:$8 sps:$4 sm:$0xff]   ;;  %v5099_v19 = vld [vmem:[%s5761_s0 + $0x2c4] ss:$8 sps:$4 sm:$0xff]  }
 0x756   : > { %v2865_v41 = vmax.f32 %v2737_v20, 0.0  ;;  %v2867_v24 = vmax.f32 %v2778_v43, 0.0  ;;  %v2872_v30 = vpack.c.bf16 %v2864_v21, %v2864_v21  ;;  %v2874_v31 = vpack.c.bf16 %v2866_v2, %v2866_v2  ;;  %v5094_v16 = vld [vmem:[%s5761_s0 + $0x3d0] ss:$8 sps:$4 sm:$0xff]   ;;  %v5102_v20 = vld [vmem:[%s5761_s0 + $0x3c4] ss:$8 sps:$4 sm:$0xff]  }
 0x757   : > { %v2739_v50 = vpop.f32.mrf.mxu0  ;;  %v2780_v34 = vpop.f32.mrf.mxu1  ;;  %v5097_v43 = vld [vmem:[%s5761_s0 + $0x2c0] ss:$8 sps:$4 sm:$0xff]   ;;  %v5105_v2 = vld [vmem:[%s5761_s0 + $0x2b4] ss:$8 sps:$4 sm:$0xff]   ;;  %v5103_v23 = vld [vmem:[%s5761_s0 + $0x2b0] ss:$8 sps:$4 sm:$0xff]  }
 0x758   : > { %v2873_v51 = vpack.c.bf16 %v2865_v41, %v2865_v41  ;;  %v2875_v27 = vpack.c.bf16 %v2867_v24, %v2867_v24  ;;  %v5100_v21 = vld [vmem:[%s5761_s0 + $0x3c0] ss:$8 sps:$4 sm:$0xff]   ;;  %v5108_v22 = vld [vmem:[%s5761_s0 + $0x3b4] ss:$8 sps:$4 sm:$0xff]   ;;  %v5106_v41 = vld [vmem:[%s5761_s0 + $0x3b0] ss:$8 sps:$4 sm:$0xff]  }
 0x759   : > { %v5111_v24 = vld [vmem:[%s5761_s0 + $0x2a4] ss:$8 sps:$4 sm:$0xff]   ;;  %v6305_v34 = vsub.s32 4, %v5914_v40 }
 0x75a   : > { %3688 = vmatprep.mubr.bf16.mxu0 %v2873_v51  ;;  %3729 = vmatprep.mubr.bf16.mxu1 %v2875_v27  ;;  %v5114_v50 = vld [vmem:[%s5761_s0 + $0x3a4] ss:$8 sps:$4 sm:$0xff]   ;;  %v5109_v51 = vld [vmem:[%s5761_s0 + $0x2a0] ss:$8 sps:$4 sm:$0xff]  }
 0x75b   : > { %3689 = vmatmul.mubr.bf16.vlgmr.msra.gmra.mxu0 %v2872_v30  ;;  %3730 = vmatmul.mubr.bf16.vlgmr.msra.gmra.mxu1 %v2874_v31  ;;  %v5112_v27 = vld [vmem:[%s5761_s0 + $0x3a0] ss:$8 sps:$4 sm:$0xff]   ;;  %v5120_v30 = vld [vmem:[%s5761_s0 + $0x394] ss:$8 sps:$4 sm:$0xff]   ;;  %v2039_v31 = vrot.slane %v6242_v17, %v6305_v34 }
 0x75c   : > { %3739 = vmatpush1.bf16.msra.mxu0 %v5031_v28  ;;  %3780 = vmatpush1.bf16.msra.mxu1 %v5034_v29  ;;  %v6310_v28 = vsub.s32 7, %v5914_v40  ;;  %v5117_v29 = vld [vmem:[%s5761_s0 + $0x294] ss:$8 sps:$4 sm:$0xff]  }
 0x75d   : > { %3740 = vmatprep.subr.bf16.mxu0 %v5039_v32  ;;  %3781 = vmatprep.subr.bf16.mxu1 %v5042_v33  ;;  %v2047_v32 = vrot.slane %v6242_v17, %v6089_v26  ;;  %v2043_v33 = vrot.slane %v6242_v17, %v6086_v25  ;;  %v5121_v25 = vld [vmem:[%s5761_s0 + $0x280] ss:$8 sps:$4 sm:$0xff]  }
 0x760   : > { %3741 = vmatpush1.bf16.msra.mxu0 %v5037_v35  ;;  %3782 = vmatpush1.bf16.msra.mxu1 %v5040_v36  ;;  %v2051_v35 = vrot.slane %v6242_v17, %v6310_v28  ;;  %v5115_v36 = vld [vmem:[%s5761_s0 + $0x290] ss:$8 sps:$4 sm:$0xff]   ;;  %v5124_v17 = vld [vmem:[%s5761_s0 + $0x380] ss:$8 sps:$4 sm:$0xff]  }
 0x761   : > { %3742 = vmatprep.subr.bf16.mxu0 %v5045_v45  ;;  %3783 = vmatprep.subr.bf16.mxu1 %v5048_v46  ;;  %v5118_v45 = vld [vmem:[%s5761_s0 + $0x390] ss:$8 sps:$4 sm:$0xff]  }
 0x764   : > { %3743 = vmatpush1.bf16.msra.mxu0 %v5043_v18  ;;  %3784 = vmatpush1.bf16.msra.mxu1 %v5046_v49  ;;  %v5123_v49 = vld [vmem:[%s5761_s0 + $0x284] ss:$8 sps:$4 sm:$0xff]  }
 0x765   : > { %3744 = vmatprep.subr.bf16.mxu0 %v5051_v47  ;;  %3785 = vmatprep.subr.bf16.mxu1 %v5054_v42  ;;  %v5126_v47 = vld [vmem:[%s5761_s0 + $0x384] ss:$8 sps:$4 sm:$0xff]  }
 0x768   : > { %3745 = vmatpush1.bf16.msra.mxu0 %v5049_v52  ;;  %3786 = vmatpush1.bf16.msra.mxu1 %v5052_v53 }
 0x769   : > { %3746 = vmatprep.subr.bf16.mxu0 %v5057_v54  ;;  %3787 = vmatprep.subr.bf16.mxu1 %v5060_v55 }
 0x76c   : > { %3747 = vmatpush1.bf16.msra.mxu0 %v5055_v56  ;;  %3788 = vmatpush1.bf16.msra.mxu1 %v5058_v57 }
 0x76d   : > { %3748 = vmatprep.subr.bf16.mxu0 %v5063_v3  ;;  %3789 = vmatprep.subr.bf16.mxu1 %v5066_v58 }
 0x770   : > { %3749 = vmatpush1.bf16.msra.mxu0 %v5061_v59  ;;  %3790 = vmatpush1.bf16.msra.mxu1 %v5064_v38 }
 0x771   : > { %3750 = vmatprep.subr.bf16.mxu0 %v5069_v48  ;;  %3791 = vmatprep.subr.bf16.mxu1 %v5072_v60 }
 0x774   : > { %3751 = vmatpush1.bf16.msra.mxu0 %v5067_v61  ;;  %3792 = vmatpush1.bf16.msra.mxu1 %v5070_v62 }
 0x775   : > { %3752 = vmatprep.subr.bf16.mxu0 %v5075_v63  ;;  %3793 = vmatprep.subr.bf16.mxu1 %v5078_v0 }
 0x778   : > { %3753 = vmatpush1.bf16.msra.mxu0 %v5073_v1  ;;  %3794 = vmatpush1.bf16.msra.mxu1 %v5076_v4 }
 0x779   : > { %3754 = vmatprep.subr.bf16.mxu0 %v5081_v5  ;;  %3795 = vmatprep.subr.bf16.mxu1 %v5084_v6 }
 0x77c   : > { %3755 = vmatpush2.bf16.msra.mxu0 %v5079_v7  ;;  %3796 = vmatpush2.bf16.msra.mxu1 %v5082_v8 }
 0x77d   : > { %3756 = vmatprep.subr.bf16.mxu0 %v5087_v9  ;;  %3797 = vmatprep.subr.bf16.mxu1 %v5090_v10 }
 0x780   : > { %3757 = vmatpush2.bf16.msra.mxu0 %v5085_v11  ;;  %3798 = vmatpush2.bf16.msra.mxu1 %v5088_v12  ;;  %v5139_v11 = vld [vmem:[%s5789_s19] sm:$0xff] }
 0x781   : > { %3758 = vmatprep.subr.bf16.mxu0 %v5093_v13  ;;  %3799 = vmatprep.subr.bf16.mxu1 %v5096_v14  ;;  %v3011_v12 = vrot.slane %v5139_v11, %v6305_v34  ;;  %v5140_v13 = vld [vmem:[%s5789_s19 + $0x8] sm:$0xff] }
 0x782   : > { %v3015_v14 = vrot.slane %v5140_v13, %v6305_v34 }
 0x784   : > { %3759 = vmatpush2.bf16.msra.mxu0 %v5091_v15  ;;  %3800 = vmatpush2.bf16.msra.mxu1 %v5094_v16 }
 0x785   : > { %3760 = vmatprep.subr.bf16.mxu0 %v5099_v19  ;;  %3801 = vmatprep.subr.bf16.mxu1 %v5102_v20 }
 0x788   : > { %3761 = vmatpush2.bf16.msra.mxu0 %v5097_v43  ;;  %3802 = vmatpush2.bf16.msra.mxu1 %v5100_v21 }
 0x789   : > { %3762 = vmatprep.subr.bf16.mxu0 %v5105_v2  ;;  %3803 = vmatprep.subr.bf16.mxu1 %v5108_v22 }
 0x78c   : > { %3763 = vmatpush2.bf16.msra.mxu0 %v5103_v23  ;;  %3804 = vmatpush2.bf16.msra.mxu1 %v5106_v41 }
 0x78d   : > { %3764 = vmatprep.subr.bf16.mxu0 %v5111_v24  ;;  %3805 = vmatprep.subr.bf16.mxu1 %v5114_v50 }
 0x790   : > { %3765 = vmatpush2.bf16.msra.mxu0 %v5109_v51  ;;  %3806 = vmatpush2.bf16.msra.mxu1 %v5112_v27 }
 0x791   : > { %v2816_v46 = vpop.f32.mrf.mxu0  ;;  %v2857_v18 = vpop.f32.mrf.mxu1  ;;  %3766 = vmatprep.subr.bf16.mxu0 %v5117_v29  ;;  %3807 = vmatprep.subr.bf16.mxu1 %v5120_v30 }
 0x792   : > { %v2817_v42 = vadd.f32 %v2816_v46, %v2039_v31  ;;  %v2858_v26 = vadd.f32 %v2857_v18, %v2047_v32 }
 0x793   : > { %v2818_v52 = vpop.f32.mrf.mxu0  ;;  %v2859_v53 = vpop.f32.mrf.mxu1 }
 0x794   : > { %v2819_v54 = vadd.f32 %v2818_v52, %v2043_v33  ;;  %v2860_v55 = vadd.f32 %v2859_v53, %v2051_v35  ;;  %3767 = vmatpush2.bf16.msra.mxu0 %v5115_v36  ;;  %3808 = vmatpush2.bf16.msra.mxu1 %v5118_v45  ;;  %v2868_v56 = vmax.f32 %v2817_v42, 0.0  ;;  %v2870_v57 = vmax.f32 %v2858_v26, 0.0 }
 0x795   : > { %v2820_v3 = vpop.f32.mrf.mxu0  ;;  %v2861_v58 = vpop.f32.mrf.mxu1  ;;  %3768 = vmatprep.subr.bf16.mxu0 %v5123_v49  ;;  %3809 = vmatprep.subr.bf16.mxu1 %v5126_v47 }
 0x796   : > { %v2869_v59 = vmax.f32 %v2819_v54, 0.0  ;;  %v2871_v38 = vmax.f32 %v2860_v55, 0.0  ;;  %v2876_v63 = vpack.c.bf16 %v2868_v56, %v2868_v56  ;;  %v2878_v0 = vpack.c.bf16 %v2870_v57, %v2870_v57  ;;  %v4560_v55 = vld [vmem:[%s5789_s19 + $0x10] ss:$0 sm:$0xff] }
 0x797   : > { %v2821_v48 = vpop.f32.mrf.mxu0  ;;  %v2862_v60 = vpop.f32.mrf.mxu1 }
 0x798   : > { %v2877_v61 = vpack.c.bf16 %v2869_v59, %v2869_v59  ;;  %v2879_v62 = vpack.c.bf16 %v2871_v38, %v2871_v38  ;;  %3769 = vmatpush2.bf16.msra.mxu0 %v5121_v25  ;;  %3810 = vmatpush2.bf16.msra.mxu1 %v5124_v17  ;;  %v4561_v25 = vld [vmem:[%s5789_s19 + $0x18] ss:$0 sm:$0xff] }
 0x79a   : > { %3770 = vmatprep.mubr.bf16.mxu0 %v2877_v61  ;;  %3811 = vmatprep.mubr.bf16.mxu1 %v2879_v62 }
 0x79b   : > { %3771 = vmatmul.mubr.bf16.vlgmr.msra.gmra.mxu0 %v2876_v63  ;;  %3812 = vmatmul.mubr.bf16.vlgmr.msra.gmra.mxu1 %v2878_v0 }
 0x81b   : > { %v3690_v1 = vpop.f32.mrf.mxu0  ;;  %v3731_v4 = vpop.f32.mrf.mxu1 }
 0x81c   : > { %v3691_v15 = vadd.f32 %v3690_v1, %v3011_v12 }
 0x81d   : > { %v3692_v5 = vpop.f32.mrf.mxu0  ;;  %v3733_v6 = vpop.f32.mrf.mxu1 }
 0x81e   : > { %v3693_v16 = vadd.f32 %v3692_v5, %v3015_v14  ;;  %v3732_v19 = vadd.f32 %v3731_v4, %v3691_v15 }
 0x81f   : > { %v3694_v7 = vpop.f32.mrf.mxu0  ;;  %v3735_v8 = vpop.f32.mrf.mxu1 }
 0x820   : > { %v3734_v21 = vadd.f32 %v3733_v6, %v3693_v16 }
 0x821   : > { %v3695_v9 = vpop.f32.mrf.mxu0  ;;  %v3736_v10 = vpop.f32.mrf.mxu1 }
 0x85b   : > { %v3772_v20 = vpop.f32.mrf.mxu0  ;;  %v3813_v43 = vpop.f32.mrf.mxu1 }
 0x85c   : > { %v3773_v2 = vadd.f32 %v3772_v20, %v3732_v19 }
 0x85d   : > { %v3774_v22 = vpop.f32.mrf.mxu0  ;;  %v3815_v23 = vpop.f32.mrf.mxu1 }
 0x85e   : > { %v3814_v41 = vadd.f32 %v3813_v43, %v3773_v2  ;;  %v3775_v24 = vadd.f32 %v3774_v22, %v3734_v21 }
 0x85f   : > { %v3776_v50 = vpop.f32.mrf.mxu0  ;;  %v3817_v51 = vpop.f32.mrf.mxu1 }
 0x860   : > { %v3816_v27 = vadd.f32 %v3815_v23, %v3775_v24  ;;  %v3820_v31 = vadd.f32 %v3814_v41, %v6103_v44  ;;  %v3841_v44 = vrot.slane %v5139_v11, %v6310_v28 }
 0x861   : > { %v3777_v29 = vpop.f32.mrf.mxu0  ;;  %v3818_v30 = vpop.f32.mrf.mxu1 }
 0x862   : > { %v3821_v34 = vadd.f32 %v3816_v27, %v6101_v37  ;;  %v3845_v37 = vrot.slane %v5140_v13, %v6310_v28 }
 0x864   : > { %v3822_v32 = vadd.f32 %v3821_v34, %v3820_v31 }
 0x866   : > { %3823 = vadd.xlane.f32.xlu0 %v3822_v32 }
 0x8ef   : > { %v3824_v33 = vpop.xlane.xlu0 %3823 }
 0x8f0   : > { %v3825_v35 = vmul.f32 0.00390625, %v3824_v33 }
 0x8f2   : > { %v3826_v36 = vsub.f32 %v3820_v31, %v3825_v35  ;;  %v3827_v45 = vsub.f32 %v3821_v34, %v3825_v35 }
 0x8f4   : > { %v3828_v46 = vmul.f32 %v3826_v36, %v3826_v36  ;;  %v3829_v18 = vmul.f32 %v3827_v45, %v3827_v45 }
 0x8f6   : > { %v3830_v49 = vadd.f32 %v3829_v18, %v3828_v46 }
 0x8f8   : > { %3831 = vadd.xlane.f32.xlu1 %v3830_v49 }
 0x981   : > { %v3832_v47 = vpop.xlane.xlu1 %3831 }
 0x982   : > { %v3833_v42 = vmul.f32 0.00390625, %v3832_v47 }
 0x984   : > { %v3834_v26 = vadd.f32 1e-05, %v3833_v42 }
 0x986   : > { %5137 = vrsqrt.f32 %v3834_v26 }
 0x993   : > { %v5138_v52 = vpop.eup %5137 }
 0x994   : > { %v3836_v53 = vmul.f32 %v5138_v52, %v3826_v36  ;;  %v3837_v54 = vmul.f32 %v5138_v52, %v3827_v45 }
 0x996   : > { %v3846_v17 = vmul.f32 %v3841_v44, %v3836_v53  ;;  %v3847_v56 = vmul.f32 %v3845_v37, %v3837_v54  ;;  %3863 = sbr.rel (%p4562_p3) target bundleno = 2471 (0x9a7), region = 92 }
 0x998   : > { %v3856_v57 = vadd.f32 %v4560_v55, %v3846_v17  ;;  %v3857_v3 = vadd.f32 %v4561_v25, %v3847_v56 }
 0x99a   : > { %3858 = vst [vmem:[#allocation2] sm:$0xff] %v3856_v57  ;;  %3859 = vst [vmem:[#allocation2 + $0x8] sm:$0xff] %v3857_v3 }
 0x99b   : > { %v5455_v58 = vmov 1966171168   ;;  %v3866_v38 = vcombine.low %v3856_v57, %v3857_v3  ;;  %vm3884_vm3 = vcmp.lt.s32.totalorder %v706_v39, 256 }
 0x99c   : > { %v3868_v59 = vunpack.c.l.s4 %v5455_v58 }
 0x99e   : > { %v3869_v48 = vunpack.c.0.s8 %v3868_v59 }
 0x9a0   : > { %v3872_v28 = vsub.s32 %v3869_v48, %v5914_v40 }
 0x9a2   : > { %v3873_v60 = vrot.slane %v3866_v38, %v3872_v28 }
 0x9a4   : > { %v3880_v61 = vrot.slane %v3873_v60, %v3872_v28 }
 0x9a6   : > { %3886 = vst.msk [vmem:[%s637_s21] sm:$0x3] %vm3884_vm3, %v3880_v61 }
 0x9a7 PF: > { %s6482_s9 = sld [smem:[#allocation25_spill]]  ;;  %s3902_s8 = sshll.u32 %s637_s21, 4  ;;  %s3903_s8 = int_to_ptr.vmem [resolvable:$true] %s3902_s8 }
 0x9a8   : > { %s6483_s3 = sld [smem:[#allocation21_spill]]  ;;  %s5309_s20 = scalar_lea.vmem %s3903_s8, 32 }
 0x9a9   : > { %s6485_s23 = sld [smem:[#allocation46_spill]]  ;;  %p5310_p11 = scmp.ne.s32.totalorder %s3903_s8, %s5309_s20 }
 0x9aa   : > { %s5456_s10 = smov [#allocation14]  }
 0x9ab   : > { %p5311_p5 = pnand %p5310_p11, %p5604_p12  ;;  %s5313_s1 = sshll.u32 %s5456_s10, 4  ;;  %s5314_s1 = int_to_ptr.vmem [resolvable:$false] %s5313_s1 }
 0x9ac   : > { %s5315_s28 = scalar_lea.vmem %s5314_s1, 64  ;;  %p5316_p0 = scmp.lt.s32.totalorder %s3903_s8, %s5314_s1 }
 0x9ad   : > { %s4576_s11 = sshll.u32 %s6482_s9, 5  ;;  %p5312_p13 = pneg %p5311_p5 }
 0x9ae   : > { %s6487_s12 = sand.u32 1, %s6483_s3   ;;  %p5317_p1 = scmp.lt.s32.totalorder %s5315_s28, %s5309_s20 }
 0x9af   : > { %s6486_s26 = smov %s6485_s23  ;;  %s3900_s13 = scalar_lea.hbm %s6485_s23, %s4576_s11 }
 0x9b0   : > { %s3888_s14 = scalar_lea.sflag [#allocation5], %s6487_s12  ;;  %p5318_p7 = por %p5317_p1, %p5316_p0 }
 0x9b2   : > { %p5319_p9 = pnand %p5318_p7, %p5312_p13 }
 0x9b4   : > { %5322 = shalt.err (!%p5319_p9)
}
 0x9b5   : > { %s5323_s30 = scalar_lea.hbm %s3900_s13, 32  ;;  %s5327_s22 = scalar_lea.hbm %s6486_s26, 64 }
 0x9b6   : > { %p5324_p10 = scmp.ne.s32.totalorder %s3900_s13, %s5323_s30  ;;  %p5328_p8 = scmp.lt.s32.totalorder %s3900_s13, %s6486_s26 }
 0x9b7   : > { %p5329_p3 = scmp.lt.s32.totalorder %s5327_s22, %s5323_s30 }
 0x9b8   : > { %p5325_p4 = pnand %p5324_p10, %p5604_p12 }
 0x9b9   : > { %p5330_p11 = por %p5329_p3, %p5328_p8 }
 0x9ba   : > { %p5326_p6 = pneg %p5325_p4 }
 0x9bc   : > { %p5331_p5 = pnand %p5330_p11, %p5326_p6 }
 0x9be   : > { %5334 = shalt.err (!%p5331_p5)
}
 0x9bf   : > { %4621 = dma.vmem_to_hbm [thread:$0]  (%p5604_p12), %s3903_s8, 32, %s3900_s13, %s3888_s14  }
 0x9c0 PF: > { %s6488_s15 = sld [smem:[#allocation28_spill]] }
 0x9c1   : > { %s6489_s24 = sld [smem:[#allocation20_spill]] }
 0x9c6   : > { %p4647_p13 = scmp.ge.s32.totalorder %s6488_s15, 2 }
 0x9c7   : > { %s3914_s19 = sand.u32 1, %s6489_s24  }
 0x9c8   : > { %p4643_p0 = pnand %p4647_p13, %p5614_p2  ;;  %s3915_s2 = scalar_lea.sflag [#allocation5], %s3914_s19 }
 0x9ca   : > { %p4644_p1 = pneg %p4643_p0 }
 0x9cc   : > { %5396 = dma.done.wait (%p4644_p1), %s3915_s2, 32  }
 0x9cd   : > { %5398 = vsyncadd (%p4644_p1), %s3915_s2, 4294967264  ;;  %s35_s23 = sadd.s32 1, %s6488_s15   ;;  %s6491_s13 = sld [smem:[#allocation21_spill]] }
 0x9ce   : > { %p32_p7 = scmp.ge.s32.totalorder %s35_s23, 6   ;;  %s6492_s14 = sld [smem:[#allocation22_spill]] }
 0x9cf   : > { %s6493_s15 = sld [smem:[#allocation33_spill]]  ;;  %s6500_s16 = smov %s5417_s17 }
 0x9d0   : > { %s6494_s4 = sld [smem:[#allocation23_spill]] }
 0x9d1   : > { %s6495_s18 = sld [smem:[#allocation32_spill]] }
 0x9d2   : > { %s6496_s19 = sld [smem:[#allocation26_spill]]  ;;  %34 = sbr.rel (!%p32_p7) target bundleno = 27 (0x1b), region = 186 }
 0x9d3   : > { %s6497_s20 = sld [smem:[#allocation27_spill]] }
 0x9d4   : > { %s6498_s21 = sld [smem:[#allocation30_spill]] }
 0x9d5   : > { %s6499_s22 = sld [smem:[#allocation31_spill]] }
 0x9d6   : > { %s6501_s17 = smov %s6494_s4 }
 0x9d7   :  { %3920 = vsyncpa [#allocation4], 1 }
 0x9d8   :  { %3922 = vsyncpa [#allocation4 + $0x1], 1 }
 0x9d9   :  { %3923 = vsyncpa [#allocation7], 1 }
 0x9da   :  { %3925 = vsyncpa [#allocation7 + $0x1], 1 }
 0x9db   :  { %3926 = vsyncpa [#allocation10], 1 }
 0x9dc   :  { %3928 = vsyncpa [#allocation10 + $0x1], 1 }
 0x9dd   :  { %3929 = vsyncpa [#allocation13], 1 }
 0x9de   :  { %3931 = vsyncpa [#allocation13 + $0x1], 1 }
 0x9df   :  { %3932 = vsyncpa [#allocation5], 1 }
 0x9e0   :  { %3934 = vsyncpa [#allocation5 + $0x1], 1 }

</bundles_post_ra>
